<compile_context>
chip_gen: v7x
topology: tpu7x:2x2x1
jax: 0.10.0
libtpu: 0.0.40
codegen_flags: <defaults>
</compile_context>

<pallas_src>
import jax
import jax.numpy as jnp
from jax.experimental import pallas as pl
from jax.experimental.pallas import tpu as pltpu

DIM = 512          # hidden width, as in the PyTorch module
OUT_PAD = 128      # 2 output features zero-padded to one full lane group
MAX_TB = 512       # max batch tile (sublane-aligned); ~5 MiB total VMEM use


def _round_up(x, m):
    return ((x + m - 1) // m) * m


def _cdiv(a, b):
    return -(-a // b)


def _mlp_kernel(x_ref, w1_ref, b1_ref, w2_ref, b2_ref,
                w3_ref, b3_ref, w4_ref, b4_ref, o_ref):
    # Layer 1: VPU outer product over the 2 input features (no padded matmul).
    x = x_ref[...]                       # (TB, 2)  f32
    w1 = w1_ref[...]                     # (2, DIM) f32
    h = x[:, 0:1] * w1[0:1, :] + x[:, 1:2] * w1[1:2, :] + b1_ref[...]
    h = jnp.maximum(h, 0.0)
    # Layer 2: bf16 x bf16 -> f32 accumulation on the MXU.
    h = jnp.dot(h.astype(jnp.bfloat16), w2_ref[...],
                preferred_element_type=jnp.float32)
    h = jnp.maximum(h + b2_ref[...], 0.0)
    # Layer 3
    h = jnp.dot(h.astype(jnp.bfloat16), w3_ref[...],
                preferred_element_type=jnp.float32)
    h = jnp.maximum(h + b3_ref[...], 0.0)
    # Output layer (lane-padded to 128, no activation)
    o = jnp.dot(h.astype(jnp.bfloat16), w4_ref[...],
                preferred_element_type=jnp.float32)
    o_ref[...] = o + b4_ref[...]


def prepare_params(params):
    """One-time (out-of-hot-path) lane padding + bf16 cast of MXU weights."""
    w1, b1, w2, b2, w3, b3, w4, b4 = params
    w4_pad = jnp.zeros((DIM, OUT_PAD), jnp.float32).at[:, :2].set(w4)
    b4_pad = jnp.zeros((1, OUT_PAD), jnp.float32).at[:, :2].set(b4)
    return (w1.astype(jnp.float32),          # layer 1 stays f32 (VPU)
            b1.astype(jnp.float32),
            w2.astype(jnp.bfloat16),         # MXU weights in bf16
            b2.astype(jnp.float32),          # biases stay f32
            w3.astype(jnp.bfloat16),
            b3.astype(jnp.float32),
            w4_pad.astype(jnp.bfloat16),
            b4_pad.astype(jnp.float32))


@jax.jit
def generator_forward(noise, real_data, padded_params):
    """Pallas implementation of Generator.forward(noise, real_data)."""
    del real_data  # FIXED_GENERATOR is False -> real_data unused
    w1, b1, w2, b2, w3, b3, w4_pad, b4_pad = padded_params

    B = noise.shape[0]
    # Batch tile: minimize padding waste while capping VMEM / per-tile size.
    if B <= MAX_TB:
        TB = _round_up(max(B, 8), 8)               # single tile, small batch
    else:
        n_tiles = _cdiv(B, MAX_TB)
        TB = _round_up(_cdiv(B, n_tiles), 8)        # near-even split, <=MAX_TB
    B_pad = _round_up(B, TB)

    x = noise.astype(jnp.float32)
    if B_pad > B:
        x = jnp.pad(x, ((0, B_pad - B), (0, 0)))

    grid = (B_pad // TB,)

    out_pad = pl.pallas_call(
        _mlp_kernel,
        out_shape=jax.ShapeDtypeStruct((B_pad, OUT_PAD), jnp.float32),
        grid_spec=pltpu.PrefetchScalarGridSpec(
            num_scalar_prefetch=0,
            grid=grid,
            in_specs=[
                pl.BlockSpec((TB, 2), lambda i: (i, 0)),           # noise tile
                pl.BlockSpec((2, DIM), lambda i: (0, 0)),          # W1 (f32)
                pl.BlockSpec((1, DIM), lambda i: (0, 0)),          # b1
                pl.BlockSpec((DIM, DIM), lambda i: (0, 0)),        # W2 (bf16)
                pl.BlockSpec((1, DIM), lambda i: (0, 0)),          # b2
                pl.BlockSpec((DIM, DIM), lambda i: (0, 0)),        # W3 (bf16)
                pl.BlockSpec((1, DIM), lambda i: (0, 0)),          # b3
                pl.BlockSpec((DIM, OUT_PAD), lambda i: (0, 0)),    # W4 (bf16, padded)
                pl.BlockSpec((1, OUT_PAD), lambda i: (0, 0)),      # b4 (padded)
            ],
            out_specs=pl.BlockSpec((TB, OUT_PAD), lambda i: (i, 0)),
        ),
        compiler_params=pltpu.CompilerParams(
            dimension_semantics=("parallel",)),
    )(x, w1, b1, w2, b2, w3, b3, w4_pad, b4_pad)

    # The module's forward returns (B, 2); trim the lane-padded output here.
    return out_pad[:B, :2]


def init_params(key):
    """Deterministic parameter init matching nn.Linear shapes (stored (in, out))."""
    ks = jax.random.split(key, 8)

    def uniform(k, shape, fan_in):
        bound = 1.0 / jnp.sqrt(float(fan_in))
        return jax.random.uniform(k, shape, jnp.float32, -bound, bound)

    w1 = uniform(ks[0], (2, DIM), 2)
    b1 = uniform(ks[1], (1, DIM), 2)
    w2 = uniform(ks[2], (DIM, DIM), DIM)
    b2 = uniform(ks[3], (1, DIM), DIM)
    w3 = uniform(ks[4], (DIM, DIM), DIM)
    b3 = uniform(ks[5], (1, DIM), DIM)
    w4 = uniform(ks[6], (DIM, 2), DIM)
    b4 = uniform(ks[7], (1, 2), DIM)
    return (w1, b1, w2, b2, w3, b3, w4, b4)


def reference_forward(noise, params, matmul_dtype=jnp.float32):
    """Pure-JAX reference.  matmul_dtype=bf16 matches the kernel's quantization."""
    w1, b1, w2, b2, w3, b3, w4, b4 = params

    def mm(a, w):
        return jnp.dot(a.astype(matmul_dtype), w.astype(matmul_dtype),
                       preferred_element_type=jnp.float32)

    h = jnp.maximum(noise.astype(jnp.float32) @ w1 + b1, 0.0)
    h = jnp.maximum(mm(h, w2) + b2, 0.0)
    h = jnp.maximum(mm(h, w3) + b3, 0.0)
    return mm(h, w4) + b4


def _check(out, noise, params):
    # Tight check vs. a reference using the same bf16 weight/activation
    # quantization (f32 accumulation) as the kernel.
    ref_bf16 = reference_forward(noise, params, matmul_dtype=jnp.bfloat16)
    assert jnp.allclose(out, ref_bf16, atol=2e-3, rtol=2e-3), (
        float(jnp.max(jnp.abs(out - ref_bf16))))
    # Loose check vs. the full-f32 (PyTorch-equivalent) reference: bf16
    # matmuls over K=512 introduce ~1e-3..1e-2 relative error.
    ref_f32 = reference_forward(noise, params, matmul_dtype=jnp.float32)
    assert jnp.allclose(out, ref_f32, atol=5e-2, rtol=5e-2), (
        float(jnp.max(jnp.abs(out - ref_f32))))


if __name__ == "__main__":
    key = jax.random.PRNGKey(0)
    k_noise, k_real, k_param = jax.random.split(key, 3)

    params = init_params(k_param)
    padded_params = prepare_params(params)   # one-time pad + bf16 cast (hoisted)

    # Small-shape test (single tile, grid=(1,)).
    batch = 8
    noise = jax.random.normal(k_noise, (batch, 2), jnp.float32)
    real_data = jax.random.normal(k_real, (batch, 2), jnp.float32)  # unused

    out = jax.block_until_ready(generator_forward(noise, real_data, padded_params))
    assert out.shape == (batch, 2), out.shape
    _check(out, noise, params)

    # Awkward batch size: B=260 -> TB=264, grid=(1,), only 4 padded rows.
    batch2 = 260
    noise2 = jax.random.normal(jax.random.PRNGKey(1), (batch2, 2), jnp.float32)
    real2 = jnp.zeros((batch2, 2), jnp.float32)
    out2 = jax.block_until_ready(generator_forward(noise2, real2, padded_params))
    assert out2.shape == (batch2, 2), out2.shape
    _check(out2, noise2, params)

    # Multi-tile path: B=640 -> TB=320, grid=(2,), zero padding.
    batch3 = 640
    noise3 = jax.random.normal(jax.random.PRNGKey(2), (batch3, 2), jnp.float32)
    real3 = jnp.zeros((batch3, 2), jnp.float32)
    out3 = jax.block_until_ready(generator_forward(noise3, real3, padded_params))
    assert out3.shape == (batch3, 2), out3.shape
    _check(out3, noise3, params)

    print("KERNEL_OK")
</pallas_src>

<mosaic_0001>
module attributes {stable_mosaic.version = 11 : i64} {
  func.func @_mlp_kernel(%arg0: i32, %arg1: memref<8x2xf32, #tpu.memory_space<vmem>>, %arg2: memref<2x512xf32, #tpu.memory_space<vmem>>, %arg3: memref<1x512xf32, #tpu.memory_space<vmem>>, %arg4: memref<512x512xbf16, #tpu.memory_space<vmem>>, %arg5: memref<1x512xf32, #tpu.memory_space<vmem>>, %arg6: memref<512x512xbf16, #tpu.memory_space<vmem>>, %arg7: memref<1x512xf32, #tpu.memory_space<vmem>>, %arg8: memref<512x128xbf16, #tpu.memory_space<vmem>>, %arg9: memref<1x128xf32, #tpu.memory_space<vmem>>, %arg10: memref<8x128xf32, #tpu.memory_space<vmem>>) attributes {dimension_semantics = [#tpu.dimension_semantics<parallel>], iteration_bounds = array<i64: 1>, scalar_prefetch = 0 : i64, scratch_operands = 0 : i64, tpu.core_type = #tpu.core_type<tc>, window_params = [{transform_indices = @transform_0, window_bounds = array<i64: 8, 2>}, {pipeline_mode = #tpu.pipeline_mode<synchronous>, transform_indices = @transform_1, window_bounds = array<i64: 2, 512>}, {pipeline_mode = #tpu.pipeline_mode<synchronous>, transform_indices = @transform_2, window_bounds = array<i64: 1, 512>}, {pipeline_mode = #tpu.pipeline_mode<synchronous>, transform_indices = @transform_3, window_bounds = array<i64: 512, 512>}, {pipeline_mode = #tpu.pipeline_mode<synchronous>, transform_indices = @transform_4, window_bounds = array<i64: 1, 512>}, {pipeline_mode = #tpu.pipeline_mode<synchronous>, transform_indices = @transform_5, window_bounds = array<i64: 512, 512>}, {pipeline_mode = #tpu.pipeline_mode<synchronous>, transform_indices = @transform_6, window_bounds = array<i64: 1, 512>}, {pipeline_mode = #tpu.pipeline_mode<synchronous>, transform_indices = @transform_7, window_bounds = array<i64: 512, 128>}, {pipeline_mode = #tpu.pipeline_mode<synchronous>, transform_indices = @transform_8, window_bounds = array<i64: 1, 128>}, {transform_indices = @transform_9, window_bounds = array<i64: 8, 128>}]} {
    %c0 = arith.constant 0 : index
    %c0_0 = arith.constant 0 : index
    %0 = vector.load %arg1[%c0, %c0_0] : memref<8x2xf32, #tpu.memory_space<vmem>>, vector<8x2xf32>
    %c0_1 = arith.constant 0 : index
    %c0_2 = arith.constant 0 : index
    %1 = vector.load %arg2[%c0_1, %c0_2] : memref<2x512xf32, #tpu.memory_space<vmem>>, vector<2x512xf32>
    %2 = vector.extract_strided_slice %0 {offsets = [0, 0], sizes = [8, 1], strides = [1, 1]} : vector<8x2xf32> to vector<8x1xf32>
    %3 = vector.extract_strided_slice %1 {offsets = [0, 0], sizes = [1, 512], strides = [1, 1]} : vector<2x512xf32> to vector<1x512xf32>
    %4 = vector.broadcast %2 : vector<8x1xf32> to vector<8x512xf32>
    %5 = vector.broadcast %3 : vector<1x512xf32> to vector<8x512xf32>
    %6 = arith.mulf %4, %5 : vector<8x512xf32>
    %7 = vector.extract_strided_slice %0 {offsets = [0, 1], sizes = [8, 1], strides = [1, 1]} : vector<8x2xf32> to vector<8x1xf32>
    %8 = vector.extract_strided_slice %1 {offsets = [1, 0], sizes = [1, 512], strides = [1, 1]} : vector<2x512xf32> to vector<1x512xf32>
    %9 = vector.broadcast %7 : vector<8x1xf32> to vector<8x512xf32>
    %10 = vector.broadcast %8 : vector<1x512xf32> to vector<8x512xf32>
    %11 = arith.mulf %9, %10 : vector<8x512xf32>
    %12 = arith.addf %6, %11 : vector<8x512xf32>
    %c0_3 = arith.constant 0 : index
    %c0_4 = arith.constant 0 : index
    %13 = vector.load %arg3[%c0_3, %c0_4] : memref<1x512xf32, #tpu.memory_space<vmem>>, vector<1x512xf32>
    %14 = vector.broadcast %13 : vector<1x512xf32> to vector<8x512xf32>
    %15 = arith.addf %12, %14 : vector<8x512xf32>
    %cst = arith.constant 0.000000e+00 : f32
    %16 = vector.broadcast %cst : f32 to vector<8x512xf32>
    %17 = arith.maximumf %15, %16 : vector<8x512xf32>
    %18 = arith.truncf %17 : vector<8x512xf32> to vector<8x512xbf16>
    %c0_5 = arith.constant 0 : index
    %c0_6 = arith.constant 0 : index
    %19 = vector.load %arg4[%c0_5, %c0_6] : memref<512x512xbf16, #tpu.memory_space<vmem>>, vector<512x512xbf16>
    %cst_7 = arith.constant dense<0.000000e+00> : vector<8x512xf32>
    %20 = tpu.matmul %18, %19, %cst_7 {dimension_numbers = #tpu.dot_dimension_numbers<[1], [0], [0], [1], [0, 0, 1, 1], [], []>} : vector<8x512xbf16>, vector<512x512xbf16>, vector<8x512xf32> -> vector<8x512xf32>
    %c0_8 = arith.constant 0 : index
    %c0_9 = arith.constant 0 : index
    %21 = vector.load %arg5[%c0_8, %c0_9] : memref<1x512xf32, #tpu.memory_space<vmem>>, vector<1x512xf32>
    %22 = vector.broadcast %21 : vector<1x512xf32> to vector<8x512xf32>
    %23 = arith.addf %20, %22 : vector<8x512xf32>
    %cst_10 = arith.constant 0.000000e+00 : f32
    %24 = vector.broadcast %cst_10 : f32 to vector<8x512xf32>
    %25 = arith.maximumf %23, %24 : vector<8x512xf32>
    %26 = arith.truncf %25 : vector<8x512xf32> to vector<8x512xbf16>
    %c0_11 = arith.constant 0 : index
    %c0_12 = arith.constant 0 : index
    %27 = vector.load %arg6[%c0_11, %c0_12] : memref<512x512xbf16, #tpu.memory_space<vmem>>, vector<512x512xbf16>
    %cst_13 = arith.constant dense<0.000000e+00> : vector<8x512xf32>
    %28 = tpu.matmul %26, %27, %cst_13 {dimension_numbers = #tpu.dot_dimension_numbers<[1], [0], [0], [1], [0, 0, 1, 1], [], []>} : vector<8x512xbf16>, vector<512x512xbf16>, vector<8x512xf32> -> vector<8x512xf32>
    %c0_14 = arith.constant 0 : index
    %c0_15 = arith.constant 0 : index
    %29 = vector.load %arg7[%c0_14, %c0_15] : memref<1x512xf32, #tpu.memory_space<vmem>>, vector<1x512xf32>
    %30 = vector.broadcast %29 : vector<1x512xf32> to vector<8x512xf32>
    %31 = arith.addf %28, %30 : vector<8x512xf32>
    %cst_16 = arith.constant 0.000000e+00 : f32
    %32 = vector.broadcast %cst_16 : f32 to vector<8x512xf32>
    %33 = arith.maximumf %31, %32 : vector<8x512xf32>
    %34 = arith.truncf %33 : vector<8x512xf32> to vector<8x512xbf16>
    %c0_17 = arith.constant 0 : index
    %c0_18 = arith.constant 0 : index
    %35 = vector.load %arg8[%c0_17, %c0_18] : memref<512x128xbf16, #tpu.memory_space<vmem>>, vector<512x128xbf16>
    %cst_19 = arith.constant dense<0.000000e+00> : vector<8x128xf32>
    %36 = tpu.matmul %34, %35, %cst_19 {dimension_numbers = #tpu.dot_dimension_numbers<[1], [0], [0], [1], [0, 0, 1, 1], [], []>} : vector<8x512xbf16>, vector<512x128xbf16>, vector<8x128xf32> -> vector<8x128xf32>
    %c0_20 = arith.constant 0 : index
    %c0_21 = arith.constant 0 : index
    %37 = vector.load %arg9[%c0_20, %c0_21] : memref<1x128xf32, #tpu.memory_space<vmem>>, vector<1x128xf32>
    %38 = vector.broadcast %37 : vector<1x128xf32> to vector<8x128xf32>
    %39 = arith.addf %36, %38 : vector<8x128xf32>
    %c0_22 = arith.constant 0 : index
    %c0_23 = arith.constant 0 : index
    %40 = vector.load %arg10[%c0_22, %c0_23] : memref<8x128xf32, #tpu.memory_space<vmem>>, vector<8x128xf32>
    tpu.vector_store %arg10[%c0_22, %c0_23], %39 {strides = array<i32>} : memref<8x128xf32, #tpu.memory_space<vmem>>, vector<8x128xf32>,
    return
  }
  func.func @transform_0(%arg0: i32) -> (i32, i32) {
    %c0_i32 = arith.constant 0 : i32
    %c0_i32_0 = arith.constant 0 : i32
    return %arg0, %c0_i32 : i32, i32
  }
  func.func @transform_1(%arg0: i32) -> (i32, i32) {
    %c0_i32 = arith.constant 0 : i32
    %c0_i32_0 = arith.constant 0 : i32
    %c0_i32_1 = arith.constant 0 : i32
    return %c0_i32, %c0_i32_0 : i32, i32
  }
  func.func @transform_2(%arg0: i32) -> (i32, i32) {
    %c0_i32 = arith.constant 0 : i32
    %c0_i32_0 = arith.constant 0 : i32
    %c0_i32_1 = arith.constant 0 : i32
    return %c0_i32, %c0_i32_0 : i32, i32
  }
  func.func @transform_3(%arg0: i32) -> (i32, i32) {
    %c0_i32 = arith.constant 0 : i32
    %c0_i32_0 = arith.constant 0 : i32
    %c0_i32_1 = arith.constant 0 : i32
    return %c0_i32, %c0_i32_0 : i32, i32
  }
  func.func @transform_4(%arg0: i32) -> (i32, i32) {
    %c0_i32 = arith.constant 0 : i32
    %c0_i32_0 = arith.constant 0 : i32
    %c0_i32_1 = arith.constant 0 : i32
    return %c0_i32, %c0_i32_0 : i32, i32
  }
  func.func @transform_5(%arg0: i32) -> (i32, i32) {
    %c0_i32 = arith.constant 0 : i32
    %c0_i32_0 = arith.constant 0 : i32
    %c0_i32_1 = arith.constant 0 : i32
    return %c0_i32, %c0_i32_0 : i32, i32
  }
  func.func @transform_6(%arg0: i32) -> (i32, i32) {
    %c0_i32 = arith.constant 0 : i32
    %c0_i32_0 = arith.constant 0 : i32
    %c0_i32_1 = arith.constant 0 : i32
    return %c0_i32, %c0_i32_0 : i32, i32
  }
  func.func @transform_7(%arg0: i32) -> (i32, i32) {
    %c0_i32 = arith.constant 0 : i32
    %c0_i32_0 = arith.constant 0 : i32
    %c0_i32_1 = arith.constant 0 : i32
    return %c0_i32, %c0_i32_0 : i32, i32
  }
  func.func @transform_8(%arg0: i32) -> (i32, i32) {
    %c0_i32 = arith.constant 0 : i32
    %c0_i32_0 = arith.constant 0 : i32
    %c0_i32_1 = arith.constant 0 : i32
    return %c0_i32, %c0_i32_0 : i32, i32
  }
  func.func @transform_9(%arg0: i32) -> (i32, i32) {
    %c0_i32 = arith.constant 0 : i32
    %c0_i32_0 = arith.constant 0 : i32
    return %arg0, %c0_i32 : i32, i32
  }
}

</mosaic_0001>

<bundles_post_ra>
// kernel: generator_forward.1
= control target key start
LH: loop header
LB: loop body
LE: loop exit
PB: predicated region body
PF: predicated region fallthrough
CT: control target
= control target key end

     0   :  { %14 = vsyncpa [#allocation3], 0  ;;  %s3525_s0 = inlined_call_operand.vmem [shape: f32[8,2], index: 0, kind: input, shape index: {}]   ;;  %s3526_s1 = inlined_call_operand.vmem [shape: f32[2,512], index: 1, kind: input, shape index: {}]   ;;  %s3527_s2 = inlined_call_operand.vmem [shape: f32[1,512], index: 2, kind: input, shape index: {}]   ;;  %s3528_s3 = inlined_call_operand.hbm [shape: bf16[512,512], index: 3, kind: input, shape index: {}]   ;;  %s3529_s4 = inlined_call_operand.vmem [shape: f32[1,512], index: 4, kind: input, shape index: {}]   ;;  %s3530_s5 = inlined_call_operand.hbm [shape: bf16[512,512], index: 5, kind: input, shape index: {}]   ;;  %s3531_s6 = inlined_call_operand.vmem [shape: f32[1,512], index: 6, kind: input, shape index: {}]   ;;  %s3532_s7 = inlined_call_operand.hbm [shape: bf16[512,128], index: 7, kind: input, shape index: {}]   ;;  %s3533_s8 = inlined_call_operand.vmem [shape: f32[1,128], index: 8, kind: input, shape index: {}]   ;;  %s3534_s9 = inlined_call_operand.vmem [shape: f32[8,128], index: 9, kind: output, shape index: {}]  }
   0x1   :  { %15 = vsyncpa [#allocation5], 0  ;;  %s3332_s30 = smov [#allocation4]   ;;  %s3333_s11 = smov [#allocation2]  }
   0x2   :  { %s41_s10 = sshll.u32 %s3332_s30, 4  ;;  %s27_s12 = sshll.u32 %s3333_s11, 4  ;;  %s42_s10 = int_to_ptr.vmem [resolvable:$true] %s41_s10  ;;  %s3391_s12 = int_to_ptr.vmem [resolvable:$true] %s27_s12 }
   0x3   :  { %s3262_s15 = scalar_lea.hbm %s3530_s5, 16384 }
   0x4   :  { %p3263_p0 = scmp.ne.s32.totalorder %s3530_s5, %s3262_s15  ;;  %p3266_p1 = scmp.lt.u32.totalorder %s3262_s15, %s3530_s5 }
   0x6   :  { %p3268_p2 = pnand %p3266_p1, %p3263_p0 }
   0x8   :  { %3271 = shalt.err (!%p3268_p2)
}
   0x9   :  { %s3272_s20 = scalar_lea.vmem %s42_s10, 16384  ;;  %p3277_p4 = scmp.lt.s32.totalorder %s42_s10, %s42_s10 }
   0xa   :  { %p3273_p3 = scmp.ne.s32.totalorder %s42_s10, %s3272_s20  ;;  %p3278_p5 = scmp.lt.s32.totalorder %s3272_s20, %s3272_s20 }
   0xc   :  { %p3279_p6 = por %p3278_p5, %p3277_p4 }
   0xe   :  { %p3280_p7 = pnand %p3279_p6, %p3273_p3 }
  0x10   :  { %3283 = shalt.err (!%p3280_p7)
}
  0x11   :  { %s3334_s21 = smov 256   ;;  %s3335_s22 = smov 16  }
  0x12   :  { %47 = dma.hbm_to_vmem [thread:$0]  %s3530_s5, 16384, %s42_s10, [#allocation5], %s3334_s21, %s3334_s21, %s3335_s22  }
  0x13   :  { %s3284_s27 = scalar_lea.hbm %s3528_s3, 16384 }
  0x14   :  { %p3285_p8 = scmp.ne.s32.totalorder %s3528_s3, %s3284_s27  ;;  %p3288_p9 = scmp.lt.u32.totalorder %s3284_s27, %s3528_s3 }
  0x16   :  { %p3290_p10 = pnand %p3288_p9, %p3285_p8 }
  0x18   :  { %3293 = shalt.err (!%p3290_p10)
}
  0x19   :  { %s3294_s13 = scalar_lea.vmem %s3391_s12, 16384  ;;  %p3299_p12 = scmp.lt.s32.totalorder %s3391_s12, %s3391_s12 }
  0x1a   :  { %p3295_p11 = scmp.ne.s32.totalorder %s3391_s12, %s3294_s13  ;;  %p3300_p13 = scmp.lt.s32.totalorder %s3294_s13, %s3294_s13 }
  0x1c   :  { %p3301_p0 = por %p3300_p13, %p3299_p12 }
  0x1e   :  { %p3302_p1 = pnand %p3301_p0, %p3295_p11 }
  0x20   :  { %3305 = shalt.err (!%p3302_p1)
}
  0x21   :  { %33 = dma.hbm_to_vmem [thread:$0]  %s3528_s3, 16384, %s3391_s12, [#allocation3], %s3334_s21, %s3334_s21, %s3335_s22  }
  0x22   :  { %s3336_s14 = smov [#allocation6]   ;;  %s3306_s18 = scalar_lea.hbm %s3532_s7, 4096 }
  0x23   :  { %s55_s15 = sshll.u32 %s3336_s14, 4  ;;  %p3307_p2 = scmp.ne.s32.totalorder %s3532_s7, %s3306_s18  ;;  %s56_s15 = int_to_ptr.vmem [resolvable:$true] %s55_s15 }
  0x24   :  { %p3310_p3 = scmp.lt.u32.totalorder %s3306_s18, %s3532_s7 }
  0x26   :  { %p3312_p4 = pnand %p3310_p3, %p3307_p2 }
  0x28   :  { %3315 = shalt.err (!%p3312_p4)
}
  0x29   :  { %s3316_s25 = scalar_lea.vmem %s56_s15, 4096  ;;  %p3321_p6 = scmp.lt.s32.totalorder %s56_s15, %s56_s15 }
  0x2a   :  { %p3317_p5 = scmp.ne.s32.totalorder %s56_s15, %s3316_s25  ;;  %p3322_p7 = scmp.lt.s32.totalorder %s3316_s25, %s3316_s25 }
  0x2c   :  { %p3323_p8 = por %p3322_p7, %p3321_p6 }
  0x2e   :  { %p3324_p9 = pnand %p3323_p8, %p3317_p5 }
  0x30   :  { %3327 = shalt.err (!%p3324_p9)
}
  0x31   :  { %s3337_s3 = smov 64   ;;  %s3338_s12 = smov 4  }
  0x32   :  { %61 = dma.hbm_to_vmem [thread:$0]  %s3532_s7, 4096, %s56_s15, [#allocation5], %s3337_s3, %s3337_s3, %s3338_s12  }
  0x33   :  { %3328 = dma.done.wait [#allocation3], 16384  }
  0x34   :  { %3329 = vsyncadd [#allocation3], 4294950912 }
  0x35   :  { %3330 = dma.done.wait [#allocation5], 20480  }
  0x36   :  { %3331 = vsyncadd [#allocation5], 4294946816  ;;  %v3339_v0 = vmov 0   ;;  %v74_v1 = vld [vmem:[%s3525_s0] sm:$0xff]  ;;  %v2848_v3 = vld [vmem:[#allocation2 + $0xc] ss:$16 sps:$4 sm:$0xff]   ;;  %v82_v30 = vlaneseq }
  0x37   :  { %2844 = vset.pattern.permute.xlu0 %v3339_v0  ;;  %v2846_v2 = vld [vmem:[#allocation2 + $0x4] ss:$16 sps:$4 sm:$0xff]   ;;  %v2850_v4 = vld [vmem:[#allocation2] ss:$16 sps:$4 sm:$0xff]   ;;  %v2851_v5 = vld [vmem:[#allocation2 + $0x8] ss:$16 sps:$4 sm:$0xff]   ;;  %1076 = vmatprep.subr.bf16.mxu1 %v2848_v3 }
  0x38   :  { %78 = vperm.xlu0 %2844, %v74_v1   ;;  %994 = vmatprep.subr.bf16.mxu0 %v2846_v2  ;;  %v2852_v6 = vld [vmem:[#allocation2 + $0x24] ss:$16 sps:$4 sm:$0xff]   ;;  %v2854_v7 = vld [vmem:[#allocation2 + $0x2c] ss:$16 sps:$4 sm:$0xff]   ;;  %v3340_v8 = vmov 1   ;;  %v3437_v34 = vshrl.u32 %v82_v30, 7 }
  0x39   :  { %995 = vmatpush1.bf16.msra.mxu0 %v2850_v4  ;;  %1077 = vmatpush1.bf16.msra.mxu1 %v2851_v5  ;;  %v2856_v9 = vld [vmem:[#allocation2 + $0x20] ss:$16 sps:$4 sm:$0xff]   ;;  %v2857_v10 = vld [vmem:[#allocation2 + $0x28] ss:$16 sps:$4 sm:$0xff]   ;;  %v2858_v11 = vld [vmem:[#allocation2 + $0x44] ss:$16 sps:$4 sm:$0xff]  }
  0x3a   :  { %996 = vmatprep.subr.bf16.mxu0 %v2852_v6  ;;  %1078 = vmatprep.subr.bf16.mxu1 %v2854_v7  ;;  %v2860_v12 = vld [vmem:[#allocation2 + $0x4c] ss:$16 sps:$4 sm:$0xff]   ;;  %v2862_v13 = vld [vmem:[#allocation2 + $0x40] ss:$16 sps:$4 sm:$0xff]   ;;  %v2863_v14 = vld [vmem:[#allocation2 + $0x48] ss:$16 sps:$4 sm:$0xff]  }
  0x3b   :  { %v2864_v15 = vld [vmem:[#allocation2 + $0x64] ss:$16 sps:$4 sm:$0xff]   ;;  %v2866_v16 = vld [vmem:[#allocation2 + $0x6c] ss:$16 sps:$4 sm:$0xff]   ;;  %v2868_v17 = vld [vmem:[#allocation2 + $0x60] ss:$16 sps:$4 sm:$0xff]  }
  0x3c   :  { %2845 = vset.pattern.permute.xlu0 %v3340_v8  ;;  %v2869_v18 = vld [vmem:[#allocation2 + $0x68] ss:$16 sps:$4 sm:$0xff]   ;;  %v2870_v19 = vld [vmem:[#allocation2 + $0x84] ss:$16 sps:$4 sm:$0xff]   ;;  %v2872_v20 = vld [vmem:[#allocation2 + $0x8c] ss:$16 sps:$4 sm:$0xff]  }
  0x3d   :  { %123 = vperm.xlu0 %2845, %v74_v1   ;;  %997 = vmatpush1.bf16.msra.mxu0 %v2856_v9  ;;  %v2874_v21 = vld [vmem:[#allocation2 + $0x80] ss:$16 sps:$4 sm:$0xff]   ;;  %v2875_v22 = vld [vmem:[#allocation2 + $0x88] ss:$16 sps:$4 sm:$0xff]   ;;  %v2876_v23 = vld [vmem:[#allocation2 + $0xa4] ss:$16 sps:$4 sm:$0xff]  }
  0x3e   :  { %1079 = vmatpush1.bf16.msra.mxu1 %v2857_v10  ;;  %998 = vmatprep.subr.bf16.mxu0 %v2858_v11  ;;  %v2878_v24 = vld [vmem:[#allocation2 + $0xac] ss:$16 sps:$4 sm:$0xff]   ;;  %v2880_v25 = vld [vmem:[#allocation2 + $0xa0] ss:$16 sps:$4 sm:$0xff]   ;;  %v2881_v26 = vld [vmem:[#allocation2 + $0xa8] ss:$16 sps:$4 sm:$0xff]  }
  0x3f   :  { %1080 = vmatprep.subr.bf16.mxu1 %v2860_v12  ;;  %v2882_v27 = vld [vmem:[#allocation2 + $0xc4] ss:$16 sps:$4 sm:$0xff]   ;;  %v2884_v28 = vld [vmem:[#allocation2 + $0xcc] ss:$16 sps:$4 sm:$0xff]   ;;  %v2886_v29 = vld [vmem:[#allocation2 + $0xc0] ss:$16 sps:$4 sm:$0xff]  }
  0x40   :  { %v2887_v31 = vld [vmem:[#allocation2 + $0xc8] ss:$16 sps:$4 sm:$0xff]   ;;  %v2888_v32 = vld [vmem:[#allocation2 + $0xe4] ss:$16 sps:$4 sm:$0xff]   ;;  %v2890_v33 = vld [vmem:[#allocation2 + $0xec] ss:$16 sps:$4 sm:$0xff]  }
  0x41   :  { %999 = vmatpush1.bf16.msra.mxu0 %v2862_v13  ;;  %v2892_v35 = vld [vmem:[#allocation2 + $0xe0] ss:$16 sps:$4 sm:$0xff]   ;;  %v2893_v36 = vld [vmem:[#allocation2 + $0xe8] ss:$16 sps:$4 sm:$0xff]   ;;  %v2894_v37 = vld [vmem:[#allocation2 + $0x104] ss:$16 sps:$4 sm:$0xff]  }
  0x42   :  { %1081 = vmatpush1.bf16.msra.mxu1 %v2863_v14  ;;  %1000 = vmatprep.subr.bf16.mxu0 %v2864_v15  ;;  %v2896_v38 = vld [vmem:[#allocation2 + $0x10c] ss:$16 sps:$4 sm:$0xff]   ;;  %v2898_v39 = vld [vmem:[#allocation2 + $0x100] ss:$16 sps:$4 sm:$0xff]   ;;  %v92_v40 = vsub.s32 4, %v3437_v34  ;;  %v136_v42 = vsub.s32 5, %v3437_v34 }
  0x43   :  { %1082 = vmatprep.subr.bf16.mxu1 %v2866_v16  ;;  %v2899_v41 = vld [vmem:[#allocation2 + $0x108] ss:$16 sps:$4 sm:$0xff]   ;;  %v2900_v43 = vld [vmem:[#allocation2 + $0x124] ss:$16 sps:$4 sm:$0xff]   ;;  %v2902_v44 = vld [vmem:[#allocation2 + $0x12c] ss:$16 sps:$4 sm:$0xff]  }
  0x44   :  { %v3444_v45 = vld [vmem:[%s3526_s1] sm:$0xff]  ;;  %v2905_v49 = vld [vmem:[#allocation2 + $0x128] ss:$16 sps:$4 sm:$0xff]   ;;  %v2908_v51 = vld [vmem:[#allocation2 + $0x14c] ss:$16 sps:$4 sm:$0xff]   ;;  %v3453_v12 = vsub.s32 0, %v3437_v34 }
  0x45   :  { %1001 = vmatpush1.bf16.msra.mxu0 %v2868_v17  ;;  %v3447_v46 = vrot.slane %v3444_v45, %v92_v40  ;;  %v2904_v47 = vld [vmem:[#allocation2 + $0x120] ss:$16 sps:$4 sm:$0xff]   ;;  %v3450_v48 = vrot.slane %v3444_v45, %v136_v42  ;;  %v2906_v50 = vld [vmem:[#allocation2 + $0x144] ss:$16 sps:$4 sm:$0xff]   ;;  %v2911_v53 = vld [vmem:[#allocation2 + $0x148] ss:$16 sps:$4 sm:$0xff]  }
  0x46   :  { %1083 = vmatpush1.bf16.msra.mxu1 %v2869_v18  ;;  %1002 = vmatprep.subr.bf16.mxu0 %v2870_v19  ;;  %v2910_v52 = vld [vmem:[#allocation2 + $0x140] ss:$16 sps:$4 sm:$0xff]   ;;  %v2912_v54 = vld [vmem:[#allocation2 + $0x164] ss:$16 sps:$4 sm:$0xff]   ;;  %v2914_v55 = vld [vmem:[#allocation2 + $0x16c] ss:$16 sps:$4 sm:$0xff]   ;;  %v85_v18 = vrot.slane %v3444_v45, %v3453_v12 }
  0x47   :  { %1084 = vmatprep.subr.bf16.mxu1 %v2872_v20  ;;  %v2916_v56 = vld [vmem:[#allocation2 + $0x160] ss:$16 sps:$4 sm:$0xff]   ;;  %v2917_v57 = vld [vmem:[#allocation2 + $0x168] ss:$16 sps:$4 sm:$0xff]   ;;  %v2918_v58 = vld [vmem:[#allocation2 + $0x184] ss:$16 sps:$4 sm:$0xff]  }
  0x48   :  { %v2920_v59 = vld [vmem:[#allocation2 + $0x18c] ss:$16 sps:$4 sm:$0xff]   ;;  %v2922_v60 = vld [vmem:[#allocation2 + $0x180] ss:$16 sps:$4 sm:$0xff]   ;;  %v2923_v61 = vld [vmem:[#allocation2 + $0x188] ss:$16 sps:$4 sm:$0xff]  }
  0x49   :  { %1003 = vmatpush1.bf16.msra.mxu0 %v2874_v21  ;;  %v2924_v62 = vld [vmem:[#allocation2 + $0x1a4] ss:$16 sps:$4 sm:$0xff]   ;;  %v2926_v63 = vld [vmem:[#allocation2 + $0x1ac] ss:$16 sps:$4 sm:$0xff]   ;;  %v2928_v0 = vld [vmem:[#allocation2 + $0x1a0] ss:$16 sps:$4 sm:$0xff]   ;;  %v113_v21 = vrot.slane %v3447_v46, %v3453_v12 }
  0x4a   :  { %1085 = vmatpush1.bf16.msra.mxu1 %v2875_v22  ;;  %1004 = vmatprep.subr.bf16.mxu0 %v2876_v23  ;;  %v2929_v1 = vld [vmem:[#allocation2 + $0x1a8] ss:$16 sps:$4 sm:$0xff]   ;;  %v2930_v2 = vld [vmem:[#allocation2 + $0x1c4] ss:$16 sps:$4 sm:$0xff]   ;;  %v2932_v3 = vld [vmem:[#allocation2 + $0x1cc] ss:$16 sps:$4 sm:$0xff]  }
  0x4b   :  { %1086 = vmatprep.subr.bf16.mxu1 %v2878_v24  ;;  %v2934_v4 = vld [vmem:[#allocation2 + $0x1c0] ss:$16 sps:$4 sm:$0xff]   ;;  %v2935_v5 = vld [vmem:[#allocation2 + $0x1c8] ss:$16 sps:$4 sm:$0xff]   ;;  %v2936_v6 = vld [vmem:[#allocation2 + $0x1e4] ss:$16 sps:$4 sm:$0xff]  }
  0x4c   :  { %v2938_v7 = vld [vmem:[#allocation2 + $0x1ec] ss:$16 sps:$4 sm:$0xff]   ;;  %v2940_v8 = vld [vmem:[#allocation2 + $0x1e0] ss:$16 sps:$4 sm:$0xff]   ;;  %v2941_v9 = vld [vmem:[#allocation2 + $0x1e8] ss:$16 sps:$4 sm:$0xff]  }
  0x4d   :  { %1005 = vmatpush1.bf16.msra.mxu0 %v2880_v25  ;;  %v2944_v10 = vld [vmem:[#allocation2 + $0x204] ss:$16 sps:$4 sm:$0xff]   ;;  %v2947_v11 = vld [vmem:[#allocation2 + $0x20c] ss:$16 sps:$4 sm:$0xff]   ;;  %v3456_v13 = vsub.s32 2, %v3437_v34  ;;  %v96_v14 = vsub.s32 6, %v3437_v34 }
  0x4e   :  { %1087 = vmatpush1.bf16.msra.mxu1 %v2881_v26  ;;  %1006 = vmatprep.subr.bf16.mxu0 %v2882_v27  ;;  %v3460_v15 = vsub.s32 1, %v3437_v34  ;;  %v3463_v16 = vsub.s32 3, %v3437_v34  ;;  %v140_v17 = vsub.s32 7, %v3437_v34  ;;  %v170_v25 = vld [vmem:[%s3527_s2] sm:$0xf]  ;;  %v105_v27 = vrot.slane %v85_v18, %v3453_v12 }
  0x4f   :  { %1088 = vmatprep.subr.bf16.mxu1 %v2884_v28  ;;  %v89_v19 = vrot.slane %v3444_v45, %v3456_v13  ;;  %v97_v20 = vrot.slane %v3444_v45, %v96_v14  ;;  %v2971_v14 = vld [vmem:[#allocation2 + $0x28c] ss:$16 sps:$4 sm:$0xff]   ;;  %v2969_v18 = vld [vmem:[#allocation2 + $0x288] ss:$16 sps:$4 sm:$0xff]  }
  0x50   :  { %v129_v22 = vrot.slane %v3444_v45, %v3460_v15  ;;  %v133_v23 = vrot.slane %v3444_v45, %v3463_v16  ;;  %v141_v24 = vrot.slane %v3444_v45, %v140_v17  ;;  %v187_v42 = vrot.slane %v170_v25, %v3463_v16  ;;  %v2966_v17 = vld [vmem:[#allocation2 + $0x280] ss:$16 sps:$4 sm:$0xff]  }
  0x51   :  { %1007 = vmatpush1.bf16.msra.mxu0 %v2886_v29  ;;  %v109_v28 = vrot.slane %v89_v19, %v3453_v12  ;;  %v117_v29 = vrot.slane %v97_v20, %v3453_v12  ;;  %v2974_v19 = vld [vmem:[#allocation2 + $0x2a4] ss:$16 sps:$4 sm:$0xff]   ;;  %v2977_v20 = vld [vmem:[#allocation2 + $0x2ac] ss:$16 sps:$4 sm:$0xff]  }
  0x52   :  { %1089 = vmatpush1.bf16.msra.mxu1 %v2887_v31  ;;  %1008 = vmatprep.subr.bf16.mxu0 %v2888_v32  ;;  %v149_v31 = vrot.slane %v129_v22, %v3460_v15  ;;  %v153_v32 = vrot.slane %v133_v23, %v3460_v15  ;;  %v161_v34 = vrot.slane %v141_v24, %v3460_v15  ;;  %v2975_v22 = vld [vmem:[#allocation2 + $0x2a8] ss:$16 sps:$4 sm:$0xff]   ;;  %v2980_v23 = vld [vmem:[#allocation2 + $0x2c4] ss:$16 sps:$4 sm:$0xff]   ;;  %v2983_v24 = vld [vmem:[#allocation2 + $0x2cc] ss:$16 sps:$4 sm:$0xff]  }
  0x53   :  { %1090 = vmatprep.subr.bf16.mxu1 %v2890_v33  ;;  %v157_v33 = vrot.slane %v3450_v48, %v3460_v15 }
  0x55   :  { %1009 = vmatpush1.bf16.msra.mxu0 %v2892_v35  ;;  %v183_v35 = vrot.slane %v170_v25, %v3456_v13 }
  0x56   :  { %1091 = vmatpush1.bf16.msra.mxu1 %v2893_v36  ;;  %1010 = vmatprep.subr.bf16.mxu0 %v2894_v37  ;;  %v179_v36 = vrot.slane %v170_v25, %v3460_v15  ;;  %v175_v37 = vrot.slane %v170_v25, %v3453_v12  ;;  %v2978_v25 = vld [vmem:[#allocation2 + $0x2c0] ss:$16 sps:$4 sm:$0xff]  }
  0x57   :  { %1092 = vmatprep.subr.bf16.mxu1 %v2896_v38 }
  0x59   :  { %1011 = vmatpush1.bf16.msra.mxu0 %v2898_v39 }
  0x5a   :  { %1093 = vmatpush1.bf16.msra.mxu1 %v2899_v41  ;;  %1012 = vmatprep.subr.bf16.mxu0 %v2900_v43 }
  0x5b   :  { %1094 = vmatprep.subr.bf16.mxu1 %v2902_v44 }
  0x5d   :  { %1013 = vmatpush1.bf16.msra.mxu0 %v2904_v47 }
  0x5e   :  { %1095 = vmatpush1.bf16.msra.mxu1 %v2905_v49  ;;  %1014 = vmatprep.subr.bf16.mxu0 %v2906_v50 }
  0x5f   :  { %1096 = vmatprep.subr.bf16.mxu1 %v2908_v51 }
  0x61   :  { %1015 = vmatpush1.bf16.msra.mxu0 %v2910_v52 }
  0x62   :  { %1097 = vmatpush1.bf16.msra.mxu1 %v2911_v53  ;;  %1016 = vmatprep.subr.bf16.mxu0 %v2912_v54 }
  0x63   :  { %1098 = vmatprep.subr.bf16.mxu1 %v2914_v55 }
  0x65   :  { %1017 = vmatpush1.bf16.msra.mxu0 %v2916_v56  ;;  %v2942_v56 = vld [vmem:[#allocation2 + $0x200] ss:$16 sps:$4 sm:$0xff]  }
  0x66   :  { %1099 = vmatpush1.bf16.msra.mxu1 %v2917_v57  ;;  %1018 = vmatprep.subr.bf16.mxu0 %v2918_v58  ;;  %v2945_v57 = vld [vmem:[#allocation2 + $0x208] ss:$16 sps:$4 sm:$0xff]  }
  0x67   :  { %1100 = vmatprep.subr.bf16.mxu1 %v2920_v59 }
  0x69   :  { %1019 = vmatpush1.bf16.msra.mxu0 %v2922_v60 }
  0x6a   :  { %1101 = vmatpush1.bf16.msra.mxu1 %v2923_v61  ;;  %1020 = vmatprep.subr.bf16.mxu0 %v2924_v62  ;;  %v2950_v62 = vld [vmem:[#allocation2 + $0x224] ss:$16 sps:$4 sm:$0xff]  }
  0x6b   :  { %1102 = vmatprep.subr.bf16.mxu1 %v2926_v63  ;;  %v2953_v63 = vld [vmem:[#allocation2 + $0x22c] ss:$16 sps:$4 sm:$0xff]  }
  0x6d   :  { %1021 = vmatpush1.bf16.msra.mxu0 %v2928_v0  ;;  %v2948_v0 = vld [vmem:[#allocation2 + $0x220] ss:$16 sps:$4 sm:$0xff]  }
  0x6e   :  { %1103 = vmatpush1.bf16.msra.mxu1 %v2929_v1  ;;  %1022 = vmatprep.subr.bf16.mxu0 %v2930_v2  ;;  %v2951_v1 = vld [vmem:[#allocation2 + $0x228] ss:$16 sps:$4 sm:$0xff]  }
  0x6f   :  { %1104 = vmatprep.subr.bf16.mxu1 %v2932_v3  ;;  %v2956_v3 = vld [vmem:[#allocation2 + $0x244] ss:$16 sps:$4 sm:$0xff]  }
  0x71   :  { %1023 = vmatpush1.bf16.msra.mxu0 %v2934_v4  ;;  %v2959_v4 = vld [vmem:[#allocation2 + $0x24c] ss:$16 sps:$4 sm:$0xff]  }
  0x72   :  { %1105 = vmatpush1.bf16.msra.mxu1 %v2935_v5  ;;  %1024 = vmatprep.subr.bf16.mxu0 %v2936_v6  ;;  %v2954_v5 = vld [vmem:[#allocation2 + $0x240] ss:$16 sps:$4 sm:$0xff]   ;;  %v2957_v6 = vld [vmem:[#allocation2 + $0x248] ss:$16 sps:$4 sm:$0xff]  }
  0x73   :  { %1106 = vmatprep.subr.bf16.mxu1 %v2938_v7  ;;  %v2962_v7 = vld [vmem:[#allocation2 + $0x264] ss:$16 sps:$4 sm:$0xff]  }
  0x75   :  { %1025 = vmatpush1.bf16.msra.mxu0 %v2940_v8  ;;  %v2965_v8 = vld [vmem:[#allocation2 + $0x26c] ss:$16 sps:$4 sm:$0xff]  }
  0x76   :  { %1107 = vmatpush1.bf16.msra.mxu1 %v2941_v9  ;;  %1035 = vmatprep.subr.bf16.mxu0 %v2944_v10  ;;  %v2960_v9 = vld [vmem:[#allocation2 + $0x260] ss:$16 sps:$4 sm:$0xff]   ;;  %v2963_v10 = vld [vmem:[#allocation2 + $0x268] ss:$16 sps:$4 sm:$0xff]  }
  0x77   :  { %1117 = vmatprep.subr.bf16.mxu1 %v2947_v11  ;;  %v2968_v11 = vld [vmem:[#allocation2 + $0x284] ss:$16 sps:$4 sm:$0xff]  }
  0xb7   :  { %v79_v26 = vpop.permute.xlu0 %78 }
  0xb8   :  { %v120_v30 = vmul.f32 %v113_v21, %v79_v26  ;;  %v118_v38 = vmul.f32 %v105_v27, %v79_v26  ;;  %v119_v39 = vmul.f32 %v109_v28, %v79_v26  ;;  %v121_v40 = vmul.f32 %v117_v29, %v79_v26  ;;  %v2972_v21 = vld [vmem:[#allocation2 + $0x2a0] ss:$16 sps:$4 sm:$0xff]   ;;  %v2981_v26 = vld [vmem:[#allocation2 + $0x2c8] ss:$16 sps:$4 sm:$0xff]   ;;  %v2986_v27 = vld [vmem:[#allocation2 + $0x2e4] ss:$16 sps:$4 sm:$0xff]  }
  0xb9   :  { %v2989_v28 = vld [vmem:[#allocation2 + $0x2ec] ss:$16 sps:$4 sm:$0xff]   ;;  %v2984_v29 = vld [vmem:[#allocation2 + $0x2e0] ss:$16 sps:$4 sm:$0xff]  }
  0xbc   :  { %v124_v41 = vpop.permute.xlu0 %123 }
  0xbd   :  { %v162_v43 = vmul.f32 %v149_v31, %v124_v41  ;;  %v163_v44 = vmul.f32 %v153_v32, %v124_v41  ;;  %v164_v45 = vmul.f32 %v157_v33, %v124_v41  ;;  %v165_v46 = vmul.f32 %v161_v34, %v124_v41  ;;  %v2992_v31 = vld [vmem:[#allocation2 + $0x304] ss:$16 sps:$4 sm:$0xff]   ;;  %v2995_v32 = vld [vmem:[#allocation2 + $0x30c] ss:$16 sps:$4 sm:$0xff]   ;;  %v2990_v33 = vld [vmem:[#allocation2 + $0x300] ss:$16 sps:$4 sm:$0xff]  }
  0xbe   :  { %v2993_v34 = vld [vmem:[#allocation2 + $0x308] ss:$16 sps:$4 sm:$0xff]   ;;  %v3002_v41 = vld [vmem:[#allocation2 + $0x340] ss:$16 sps:$4 sm:$0xff]  }
  0xbf   :  { %v166_v47 = vadd.f32 %v162_v43, %v118_v38  ;;  %v168_v48 = vadd.f32 %v164_v45, %v120_v30  ;;  %v169_v49 = vadd.f32 %v165_v46, %v121_v40  ;;  %v167_v50 = vadd.f32 %v163_v44, %v119_v39  ;;  %v2987_v30 = vld [vmem:[#allocation2 + $0x2e8] ss:$16 sps:$4 sm:$0xff]   ;;  %v3004_v39 = vld [vmem:[#allocation2 + $0x344] ss:$16 sps:$4 sm:$0xff]   ;;  %v3007_v40 = vld [vmem:[#allocation2 + $0x34c] ss:$16 sps:$4 sm:$0xff]  }
  0xc0   :  { %v2999_v38 = vld [vmem:[#allocation2 + $0x328] ss:$16 sps:$4 sm:$0xff]   ;;  %v3010_v43 = vld [vmem:[#allocation2 + $0x364] ss:$16 sps:$4 sm:$0xff]   ;;  %v3013_v44 = vld [vmem:[#allocation2 + $0x36c] ss:$16 sps:$4 sm:$0xff]  }
  0xc1   :  { %v3493_v51 = vadd.f32 %v183_v35, %v168_v48  ;;  %v193_v52 = vadd.f32 %v179_v36, %v167_v50  ;;  %v192_v53 = vadd.f32 %v175_v37, %v166_v47  ;;  %v195_v54 = vadd.f32 %v187_v42, %v169_v49  ;;  %v2998_v35 = vld [vmem:[#allocation2 + $0x324] ss:$16 sps:$4 sm:$0xff]   ;;  %v3001_v36 = vld [vmem:[#allocation2 + $0x32c] ss:$16 sps:$4 sm:$0xff]   ;;  %v2996_v37 = vld [vmem:[#allocation2 + $0x320] ss:$16 sps:$4 sm:$0xff]  }
  0xc2   :  { %v3005_v42 = vld [vmem:[#allocation2 + $0x348] ss:$16 sps:$4 sm:$0xff]   ;;  %v3008_v45 = vld [vmem:[#allocation2 + $0x360] ss:$16 sps:$4 sm:$0xff]   ;;  %v3016_v47 = vld [vmem:[#allocation2 + $0x384] ss:$16 sps:$4 sm:$0xff]  }
  0xc3   :  { %v197_v55 = vmax.f32 %v193_v52, 0.0  ;;  %v196_v58 = vmax.f32 %v192_v53, 0.0  ;;  %v199_v59 = vmax.f32 %v195_v54, 0.0  ;;  %v3011_v46 = vld [vmem:[#allocation2 + $0x368] ss:$16 sps:$4 sm:$0xff]  }
  0xc4   :  { %v3019_v48 = vld [vmem:[#allocation2 + $0x38c] ss:$16 sps:$4 sm:$0xff]   ;;  %v3014_v49 = vld [vmem:[#allocation2 + $0x380] ss:$16 sps:$4 sm:$0xff]   ;;  %v3017_v50 = vld [vmem:[#allocation2 + $0x388] ss:$16 sps:$4 sm:$0xff]  }
  0xc5   :  { %v201_v60 = vpack.c.bf16 %v197_v55, %v197_v55  ;;  %v200_v61 = vpack.c.bf16 %v196_v58, %v196_v58  ;;  %v203_v2 = vpack.c.bf16 %v199_v59, %v199_v59  ;;  %v3022_v52 = vld [vmem:[#allocation2 + $0x3a4] ss:$16 sps:$4 sm:$0xff]   ;;  %v3025_v53 = vld [vmem:[#allocation2 + $0x3ac] ss:$16 sps:$4 sm:$0xff]   ;;  %v3020_v54 = vld [vmem:[#allocation2 + $0x3a0] ss:$16 sps:$4 sm:$0xff]  }
  0xc6   :  { %v3023_v55 = vld [vmem:[#allocation2 + $0x3a8] ss:$16 sps:$4 sm:$0xff]   ;;  %v3026_v58 = vld [vmem:[#allocation2 + $0x3c0] ss:$16 sps:$4 sm:$0xff]  }
  0xc7   :  { %1026 = vmatprep.mubr.bf16.mxu0 %v201_v60  ;;  %1108 = vmatprep.mubr.bf16.mxu1 %v201_v60  ;;  %v3029_v59 = vld [vmem:[#allocation2 + $0x3c8] ss:$16 sps:$4 sm:$0xff]   ;;  %v3034_v60 = vld [vmem:[#allocation2 + $0x3e4] ss:$16 sps:$4 sm:$0xff]  }
  0xc8   :  { %1027 = vmatmul.mubr.bf16.vlgmr.msra.gmra.mrb[0].mxu0 %v200_v61  ;;  %1109 = vmatmul.mubr.bf16.vlgmr.msra.gmra.mrb[0].mxu1 %v200_v61  ;;  %v3037_v61 = vld [vmem:[#allocation2 + $0x3ec] ss:$16 sps:$4 sm:$0xff]  }
  0xc9   :  { %1036 = vmatpush1.bf16.msra.mxu0 %v2942_v56  ;;  %1118 = vmatpush1.bf16.msra.mxu1 %v2945_v57  ;;  %v3028_v56 = vld [vmem:[#allocation2 + $0x3c4] ss:$16 sps:$4 sm:$0xff]   ;;  %v3031_v57 = vld [vmem:[#allocation2 + $0x3cc] ss:$16 sps:$4 sm:$0xff]  }
  0xca   :  { %1067 = vmatprep.mubr.bf16.mxu0 %v203_v2  ;;  %1149 = vmatprep.mubr.bf16.mxu1 %v203_v2  ;;  %v3043_v2 = vld [vmem:[#allocation4 + $0xc] ss:$16 sps:$4 sm:$0xff]  }
  0xcb   :  { %1037 = vmatprep.subr.bf16.mxu0 %v2950_v62  ;;  %1119 = vmatprep.subr.bf16.mxu1 %v2953_v63  ;;  %v3032_v62 = vld [vmem:[#allocation2 + $0x3e0] ss:$16 sps:$4 sm:$0xff]   ;;  %v3035_v63 = vld [vmem:[#allocation2 + $0x3e8] ss:$16 sps:$4 sm:$0xff]  }
  0xcd   :  { %1038 = vmatpush1.bf16.msra.mxu0 %v2948_v0  ;;  %1120 = vmatpush1.bf16.msra.mxu1 %v2951_v1  ;;  %v198_v0 = vmax.f32 %v3493_v51, 0.0  ;;  %v3040_v1 = vld [vmem:[#allocation4 + $0x4] ss:$16 sps:$4 sm:$0xff]  }
  0xce   :  { %1039 = vmatprep.subr.bf16.mxu0 %v2956_v3  ;;  %1121 = vmatprep.subr.bf16.mxu1 %v2959_v4  ;;  %v3038_v3 = vld [vmem:[#allocation4] ss:$16 sps:$4 sm:$0xff]   ;;  %v3041_v4 = vld [vmem:[#allocation4 + $0x8] ss:$16 sps:$4 sm:$0xff]   ;;  %v3052_v51 = vld [vmem:[#allocation4 + $0x44] ss:$16 sps:$4 sm:$0xff]  }
  0xd1   :  { %1040 = vmatpush1.bf16.msra.mxu0 %v2954_v5  ;;  %1122 = vmatpush1.bf16.msra.mxu1 %v2957_v6  ;;  %v202_v5 = vpack.c.bf16 %v198_v0, %v198_v0  ;;  %v3046_v6 = vld [vmem:[#allocation4 + $0x24] ss:$16 sps:$4 sm:$0xff]   ;;  %v3122_v0 = vld [vmem:[#allocation4 + $0x1c0] ss:$16 sps:$4 sm:$0xff]  }
  0xd2   :  { %1041 = vmatprep.subr.bf16.mxu0 %v2962_v7  ;;  %1123 = vmatprep.subr.bf16.mxu1 %v2965_v8  ;;  %v3049_v7 = vld [vmem:[#allocation4 + $0x2c] ss:$16 sps:$4 sm:$0xff]   ;;  %v3044_v8 = vld [vmem:[#allocation4 + $0x20] ss:$16 sps:$4 sm:$0xff]  }
  0xd5   :  { %1042 = vmatpush1.bf16.msra.mxu0 %v2960_v9  ;;  %1124 = vmatpush1.bf16.msra.mxu1 %v2963_v10  ;;  %v3047_v9 = vld [vmem:[#allocation4 + $0x28] ss:$16 sps:$4 sm:$0xff]   ;;  %v3055_v10 = vld [vmem:[#allocation4 + $0x4c] ss:$16 sps:$4 sm:$0xff]  }
  0xd6   :  { %1043 = vmatprep.subr.bf16.mxu0 %v2968_v11  ;;  %1125 = vmatprep.subr.bf16.mxu1 %v2971_v14  ;;  %v3050_v11 = vld [vmem:[#allocation4 + $0x40] ss:$16 sps:$4 sm:$0xff]   ;;  %v3053_v14 = vld [vmem:[#allocation4 + $0x48] ss:$16 sps:$4 sm:$0xff]  }
  0xd9   :  { %1044 = vmatpush1.bf16.msra.mxu0 %v2966_v17  ;;  %1126 = vmatpush1.bf16.msra.mxu1 %v2969_v18  ;;  %v3058_v17 = vld [vmem:[#allocation4 + $0x64] ss:$16 sps:$4 sm:$0xff]   ;;  %v3061_v18 = vld [vmem:[#allocation4 + $0x6c] ss:$16 sps:$4 sm:$0xff]  }
  0xda   :  { %1045 = vmatprep.subr.bf16.mxu0 %v2974_v19  ;;  %1127 = vmatprep.subr.bf16.mxu1 %v2977_v20  ;;  %v3056_v19 = vld [vmem:[#allocation4 + $0x60] ss:$16 sps:$4 sm:$0xff]   ;;  %v3059_v20 = vld [vmem:[#allocation4 + $0x68] ss:$16 sps:$4 sm:$0xff]  }
  0xdd   :  { %1046 = vmatpush1.bf16.msra.mxu0 %v2972_v21  ;;  %1128 = vmatpush1.bf16.msra.mxu1 %v2975_v22  ;;  %v3064_v21 = vld [vmem:[#allocation4 + $0x84] ss:$16 sps:$4 sm:$0xff]   ;;  %v3067_v22 = vld [vmem:[#allocation4 + $0x8c] ss:$16 sps:$4 sm:$0xff]  }
  0xde   :  { %1047 = vmatprep.subr.bf16.mxu0 %v2980_v23  ;;  %1129 = vmatprep.subr.bf16.mxu1 %v2983_v24  ;;  %v3062_v23 = vld [vmem:[#allocation4 + $0x80] ss:$16 sps:$4 sm:$0xff]   ;;  %v3065_v24 = vld [vmem:[#allocation4 + $0x88] ss:$16 sps:$4 sm:$0xff]  }
  0xe1   :  { %1048 = vmatpush1.bf16.msra.mxu0 %v2978_v25  ;;  %1130 = vmatpush1.bf16.msra.mxu1 %v2981_v26  ;;  %v3070_v25 = vld [vmem:[#allocation4 + $0xa4] ss:$16 sps:$4 sm:$0xff]   ;;  %v3073_v26 = vld [vmem:[#allocation4 + $0xac] ss:$16 sps:$4 sm:$0xff]  }
  0xe2   :  { %1049 = vmatprep.subr.bf16.mxu0 %v2986_v27  ;;  %1131 = vmatprep.subr.bf16.mxu1 %v2989_v28  ;;  %v3068_v27 = vld [vmem:[#allocation4 + $0xa0] ss:$16 sps:$4 sm:$0xff]   ;;  %v3071_v28 = vld [vmem:[#allocation4 + $0xa8] ss:$16 sps:$4 sm:$0xff]  }
  0xe5   :  { %1050 = vmatpush1.bf16.msra.mxu0 %v2984_v29  ;;  %1132 = vmatpush1.bf16.msra.mxu1 %v2987_v30  ;;  %v3076_v29 = vld [vmem:[#allocation4 + $0xc4] ss:$16 sps:$4 sm:$0xff]   ;;  %v3079_v30 = vld [vmem:[#allocation4 + $0xcc] ss:$16 sps:$4 sm:$0xff]  }
  0xe6   :  { %1051 = vmatprep.subr.bf16.mxu0 %v2992_v31  ;;  %1133 = vmatprep.subr.bf16.mxu1 %v2995_v32  ;;  %v3074_v31 = vld [vmem:[#allocation4 + $0xc0] ss:$16 sps:$4 sm:$0xff]   ;;  %v3077_v32 = vld [vmem:[#allocation4 + $0xc8] ss:$16 sps:$4 sm:$0xff]  }
  0xe9   :  { %1052 = vmatpush1.bf16.msra.mxu0 %v2990_v33  ;;  %1134 = vmatpush1.bf16.msra.mxu1 %v2993_v34  ;;  %v3082_v33 = vld [vmem:[#allocation4 + $0xe4] ss:$16 sps:$4 sm:$0xff]   ;;  %v3085_v34 = vld [vmem:[#allocation4 + $0xec] ss:$16 sps:$4 sm:$0xff]  }
  0xea   :  { %1053 = vmatprep.subr.bf16.mxu0 %v2998_v35  ;;  %1135 = vmatprep.subr.bf16.mxu1 %v3001_v36  ;;  %v3080_v35 = vld [vmem:[#allocation4 + $0xe0] ss:$16 sps:$4 sm:$0xff]   ;;  %v3083_v36 = vld [vmem:[#allocation4 + $0xe8] ss:$16 sps:$4 sm:$0xff]  }
  0xed   :  { %1054 = vmatpush1.bf16.msra.mxu0 %v2996_v37  ;;  %1136 = vmatpush1.bf16.msra.mxu1 %v2999_v38  ;;  %v3088_v37 = vld [vmem:[#allocation4 + $0x104] ss:$16 sps:$4 sm:$0xff]   ;;  %v3091_v38 = vld [vmem:[#allocation4 + $0x10c] ss:$16 sps:$4 sm:$0xff]  }
  0xee   :  { %1055 = vmatprep.subr.bf16.mxu0 %v3004_v39  ;;  %1137 = vmatprep.subr.bf16.mxu1 %v3007_v40  ;;  %v3086_v39 = vld [vmem:[#allocation4 + $0x100] ss:$16 sps:$4 sm:$0xff]   ;;  %v3089_v40 = vld [vmem:[#allocation4 + $0x108] ss:$16 sps:$4 sm:$0xff]  }
  0xf1   :  { %1056 = vmatpush1.bf16.msra.mxu0 %v3002_v41  ;;  %1138 = vmatpush1.bf16.msra.mxu1 %v3005_v42  ;;  %v3094_v41 = vld [vmem:[#allocation4 + $0x124] ss:$16 sps:$4 sm:$0xff]   ;;  %v3097_v42 = vld [vmem:[#allocation4 + $0x12c] ss:$16 sps:$4 sm:$0xff]  }
  0xf2   :  { %1057 = vmatprep.subr.bf16.mxu0 %v3010_v43  ;;  %1139 = vmatprep.subr.bf16.mxu1 %v3013_v44  ;;  %v3092_v43 = vld [vmem:[#allocation4 + $0x120] ss:$16 sps:$4 sm:$0xff]   ;;  %v3095_v44 = vld [vmem:[#allocation4 + $0x128] ss:$16 sps:$4 sm:$0xff]  }
  0xf5   :  { %1058 = vmatpush1.bf16.msra.mxu0 %v3008_v45  ;;  %1140 = vmatpush1.bf16.msra.mxu1 %v3011_v46  ;;  %v3100_v45 = vld [vmem:[#allocation4 + $0x144] ss:$16 sps:$4 sm:$0xff]   ;;  %v3103_v46 = vld [vmem:[#allocation4 + $0x14c] ss:$16 sps:$4 sm:$0xff]  }
  0xf6   :  { %1059 = vmatprep.subr.bf16.mxu0 %v3016_v47  ;;  %1141 = vmatprep.subr.bf16.mxu1 %v3019_v48  ;;  %v3098_v47 = vld [vmem:[#allocation4 + $0x140] ss:$16 sps:$4 sm:$0xff]   ;;  %v3101_v48 = vld [vmem:[#allocation4 + $0x148] ss:$16 sps:$4 sm:$0xff]  }
  0xf9   :  { %1060 = vmatpush1.bf16.msra.mxu0 %v3014_v49  ;;  %1142 = vmatpush1.bf16.msra.mxu1 %v3017_v50  ;;  %v3106_v49 = vld [vmem:[#allocation4 + $0x164] ss:$16 sps:$4 sm:$0xff]   ;;  %v3109_v50 = vld [vmem:[#allocation4 + $0x16c] ss:$16 sps:$4 sm:$0xff]  }
  0xfa   :  { %1061 = vmatprep.subr.bf16.mxu0 %v3022_v52  ;;  %1143 = vmatprep.subr.bf16.mxu1 %v3025_v53  ;;  %v3104_v52 = vld [vmem:[#allocation4 + $0x160] ss:$16 sps:$4 sm:$0xff]   ;;  %v3107_v53 = vld [vmem:[#allocation4 + $0x168] ss:$16 sps:$4 sm:$0xff]  }
  0xfd   :  { %1062 = vmatpush1.bf16.msra.mxu0 %v3020_v54  ;;  %1144 = vmatpush1.bf16.msra.mxu1 %v3023_v55  ;;  %v3112_v54 = vld [vmem:[#allocation4 + $0x184] ss:$16 sps:$4 sm:$0xff]   ;;  %v3115_v55 = vld [vmem:[#allocation4 + $0x18c] ss:$16 sps:$4 sm:$0xff]  }
  0xfe   :  { %1063 = vmatprep.subr.bf16.mxu0 %v3028_v56  ;;  %1145 = vmatprep.subr.bf16.mxu1 %v3031_v57  ;;  %v3110_v56 = vld [vmem:[#allocation4 + $0x180] ss:$16 sps:$4 sm:$0xff]   ;;  %v3113_v57 = vld [vmem:[#allocation4 + $0x188] ss:$16 sps:$4 sm:$0xff]  }
 0x101   :  { %1064 = vmatpush1.bf16.msra.mxu0 %v3026_v58  ;;  %1146 = vmatpush1.bf16.msra.mxu1 %v3029_v59  ;;  %v3118_v58 = vld [vmem:[#allocation4 + $0x1a4] ss:$16 sps:$4 sm:$0xff]   ;;  %v3121_v59 = vld [vmem:[#allocation4 + $0x1ac] ss:$16 sps:$4 sm:$0xff]  }
 0x102   :  { %1065 = vmatprep.subr.bf16.mxu0 %v3034_v60  ;;  %1147 = vmatprep.subr.bf16.mxu1 %v3037_v61  ;;  %v3116_v60 = vld [vmem:[#allocation4 + $0x1a0] ss:$16 sps:$4 sm:$0xff]   ;;  %v3119_v61 = vld [vmem:[#allocation4 + $0x1a8] ss:$16 sps:$4 sm:$0xff]  }
 0x105   :  { %1066 = vmatpush1.bf16.msra.mxu0 %v3032_v62  ;;  %1148 = vmatpush1.bf16.msra.mxu1 %v3035_v63  ;;  %v3124_v62 = vld [vmem:[#allocation4 + $0x1c4] ss:$16 sps:$4 sm:$0xff]   ;;  %v3127_v63 = vld [vmem:[#allocation4 + $0x1cc] ss:$16 sps:$4 sm:$0xff]  }
 0x106   :  { %1956 = vmatprep.subr.bf16.mxu0 %v3040_v1  ;;  %2038 = vmatprep.subr.bf16.mxu1 %v3043_v2  ;;  %v3125_v1 = vld [vmem:[#allocation4 + $0x1c8] ss:$16 sps:$4 sm:$0xff]   ;;  %v3130_v2 = vld [vmem:[#allocation4 + $0x1e4] ss:$16 sps:$4 sm:$0xff]  }
 0x108   :  { %1068 = vmatmul.mubr.bf16.vlgmr.msra.gmra.mrb[0].mxu0 %v202_v5  ;;  %1150 = vmatmul.mubr.bf16.vlgmr.msra.gmra.mrb[0].mxu1 %v202_v5  ;;  %v3131_v5 = vld [vmem:[#allocation4 + $0x1e8] ss:$16 sps:$4 sm:$0xff]  }
 0x109   :  { %1957 = vmatpush1.bf16.msra.mxu0 %v3038_v3  ;;  %2039 = vmatpush1.bf16.msra.mxu1 %v3041_v4  ;;  %v3133_v3 = vld [vmem:[#allocation4 + $0x1ec] ss:$16 sps:$4 sm:$0xff]   ;;  %v3128_v4 = vld [vmem:[#allocation4 + $0x1e0] ss:$16 sps:$4 sm:$0xff]  }
 0x10a   :  { %1958 = vmatprep.subr.bf16.mxu0 %v3046_v6  ;;  %2040 = vmatprep.subr.bf16.mxu1 %v3049_v7  ;;  %v3136_v6 = vld [vmem:[#allocation4 + $0x204] ss:$16 sps:$4 sm:$0xff]   ;;  %v3139_v7 = vld [vmem:[#allocation4 + $0x20c] ss:$16 sps:$4 sm:$0xff]  }
 0x10d   :  { %1959 = vmatpush1.bf16.msra.mxu0 %v3044_v8  ;;  %2041 = vmatpush1.bf16.msra.mxu1 %v3047_v9  ;;  %v3499_v8 = vld [vmem:[%s3529_s4] sm:$0xf] }
 0x10e   :  { %1960 = vmatprep.subr.bf16.mxu0 %v3052_v51  ;;  %2042 = vmatprep.subr.bf16.mxu1 %v3055_v10  ;;  %v337_v9 = vrot.slane %v3499_v8, %v3453_v12  ;;  %v341_v51 = vrot.slane %v3499_v8, %v3460_v15  ;;  %v349_v10 = vrot.slane %v3499_v8, %v3463_v16 }
 0x111   :  { %1961 = vmatpush1.bf16.msra.mxu0 %v3050_v11  ;;  %2043 = vmatpush1.bf16.msra.mxu1 %v3053_v14 }
 0x112   :  { %1962 = vmatprep.subr.bf16.mxu0 %v3058_v17  ;;  %2044 = vmatprep.subr.bf16.mxu1 %v3061_v18 }
 0x115   :  { %1963 = vmatpush1.bf16.msra.mxu0 %v3056_v19  ;;  %2045 = vmatpush1.bf16.msra.mxu1 %v3059_v20 }
 0x116   :  { %1964 = vmatprep.subr.bf16.mxu0 %v3064_v21  ;;  %2046 = vmatprep.subr.bf16.mxu1 %v3067_v22 }
 0x119   :  { %1965 = vmatpush1.bf16.msra.mxu0 %v3062_v23  ;;  %2047 = vmatpush1.bf16.msra.mxu1 %v3065_v24 }
 0x11a   :  { %1966 = vmatprep.subr.bf16.mxu0 %v3070_v25  ;;  %2048 = vmatprep.subr.bf16.mxu1 %v3073_v26 }
 0x11d   :  { %1967 = vmatpush1.bf16.msra.mxu0 %v3068_v27  ;;  %2049 = vmatpush1.bf16.msra.mxu1 %v3071_v28 }
 0x11e   :  { %1968 = vmatprep.subr.bf16.mxu0 %v3076_v29  ;;  %2050 = vmatprep.subr.bf16.mxu1 %v3079_v30  ;;  %v3134_v30 = vld [vmem:[#allocation4 + $0x200] ss:$16 sps:$4 sm:$0xff]  }
 0x121   :  { %1969 = vmatpush1.bf16.msra.mxu0 %v3074_v31  ;;  %2051 = vmatpush1.bf16.msra.mxu1 %v3077_v32  ;;  %v3137_v31 = vld [vmem:[#allocation4 + $0x208] ss:$16 sps:$4 sm:$0xff]  }
 0x122   :  { %1970 = vmatprep.subr.bf16.mxu0 %v3082_v33  ;;  %2052 = vmatprep.subr.bf16.mxu1 %v3085_v34  ;;  %v3142_v33 = vld [vmem:[#allocation4 + $0x224] ss:$16 sps:$4 sm:$0xff]   ;;  %v3145_v34 = vld [vmem:[#allocation4 + $0x22c] ss:$16 sps:$4 sm:$0xff]  }
 0x125   :  { %1971 = vmatpush1.bf16.msra.mxu0 %v3080_v35  ;;  %2053 = vmatpush1.bf16.msra.mxu1 %v3083_v36  ;;  %v3140_v36 = vld [vmem:[#allocation4 + $0x220] ss:$16 sps:$4 sm:$0xff]  }
 0x126   :  { %1972 = vmatprep.subr.bf16.mxu0 %v3088_v37  ;;  %2054 = vmatprep.subr.bf16.mxu1 %v3091_v38  ;;  %v3143_v37 = vld [vmem:[#allocation4 + $0x228] ss:$16 sps:$4 sm:$0xff]   ;;  %v3148_v38 = vld [vmem:[#allocation4 + $0x244] ss:$16 sps:$4 sm:$0xff]  }
 0x129   :  { %1973 = vmatpush1.bf16.msra.mxu0 %v3086_v39  ;;  %2055 = vmatpush1.bf16.msra.mxu1 %v3089_v40  ;;  %v3151_v39 = vld [vmem:[#allocation4 + $0x24c] ss:$16 sps:$4 sm:$0xff]   ;;  %v3146_v40 = vld [vmem:[#allocation4 + $0x240] ss:$16 sps:$4 sm:$0xff]  }
 0x12a   :  { %1974 = vmatprep.subr.bf16.mxu0 %v3094_v41  ;;  %2056 = vmatprep.subr.bf16.mxu1 %v3097_v42  ;;  %v3149_v41 = vld [vmem:[#allocation4 + $0x248] ss:$16 sps:$4 sm:$0xff]   ;;  %v3154_v42 = vld [vmem:[#allocation4 + $0x264] ss:$16 sps:$4 sm:$0xff]  }
 0x12d   :  { %1975 = vmatpush1.bf16.msra.mxu0 %v3092_v43  ;;  %2057 = vmatpush1.bf16.msra.mxu1 %v3095_v44  ;;  %v3157_v43 = vld [vmem:[#allocation4 + $0x26c] ss:$16 sps:$4 sm:$0xff]   ;;  %v3152_v44 = vld [vmem:[#allocation4 + $0x260] ss:$16 sps:$4 sm:$0xff]  }
 0x12e   :  { %1976 = vmatprep.subr.bf16.mxu0 %v3100_v45  ;;  %2058 = vmatprep.subr.bf16.mxu1 %v3103_v46  ;;  %v3155_v45 = vld [vmem:[#allocation4 + $0x268] ss:$16 sps:$4 sm:$0xff]   ;;  %v3160_v46 = vld [vmem:[#allocation4 + $0x284] ss:$16 sps:$4 sm:$0xff]  }
 0x131   :  { %1977 = vmatpush1.bf16.msra.mxu0 %v3098_v47  ;;  %2059 = vmatpush1.bf16.msra.mxu1 %v3101_v48  ;;  %v3163_v47 = vld [vmem:[#allocation4 + $0x28c] ss:$16 sps:$4 sm:$0xff]   ;;  %v3158_v48 = vld [vmem:[#allocation4 + $0x280] ss:$16 sps:$4 sm:$0xff]  }
 0x132   :  { %1978 = vmatprep.subr.bf16.mxu0 %v3106_v49  ;;  %2060 = vmatprep.subr.bf16.mxu1 %v3109_v50  ;;  %v3161_v49 = vld [vmem:[#allocation4 + $0x288] ss:$16 sps:$4 sm:$0xff]   ;;  %v3166_v50 = vld [vmem:[#allocation4 + $0x2a4] ss:$16 sps:$4 sm:$0xff]  }
 0x135   :  { %1979 = vmatpush1.bf16.msra.mxu0 %v3104_v52  ;;  %2061 = vmatpush1.bf16.msra.mxu1 %v3107_v53  ;;  %v3169_v52 = vld [vmem:[#allocation4 + $0x2ac] ss:$16 sps:$4 sm:$0xff]   ;;  %v3164_v53 = vld [vmem:[#allocation4 + $0x2a0] ss:$16 sps:$4 sm:$0xff]  }
 0x136   :  { %1980 = vmatprep.subr.bf16.mxu0 %v3112_v54  ;;  %2062 = vmatprep.subr.bf16.mxu1 %v3115_v55  ;;  %v3167_v54 = vld [vmem:[#allocation4 + $0x2a8] ss:$16 sps:$4 sm:$0xff]   ;;  %v3172_v55 = vld [vmem:[#allocation4 + $0x2c4] ss:$16 sps:$4 sm:$0xff]  }
 0x139   :  { %1981 = vmatpush1.bf16.msra.mxu0 %v3110_v56  ;;  %2063 = vmatpush1.bf16.msra.mxu1 %v3113_v57  ;;  %v3175_v56 = vld [vmem:[#allocation4 + $0x2cc] ss:$16 sps:$4 sm:$0xff]   ;;  %v3170_v57 = vld [vmem:[#allocation4 + $0x2c0] ss:$16 sps:$4 sm:$0xff]  }
 0x13a   :  { %1982 = vmatprep.subr.bf16.mxu0 %v3118_v58  ;;  %2064 = vmatprep.subr.bf16.mxu1 %v3121_v59  ;;  %v3173_v58 = vld [vmem:[#allocation4 + $0x2c8] ss:$16 sps:$4 sm:$0xff]   ;;  %v3178_v59 = vld [vmem:[#allocation4 + $0x2e4] ss:$16 sps:$4 sm:$0xff]  }
 0x13d   :  { %1983 = vmatpush1.bf16.msra.mxu0 %v3116_v60  ;;  %2065 = vmatpush1.bf16.msra.mxu1 %v3119_v61  ;;  %v3181_v60 = vld [vmem:[#allocation4 + $0x2ec] ss:$16 sps:$4 sm:$0xff]   ;;  %v3176_v61 = vld [vmem:[#allocation4 + $0x2e0] ss:$16 sps:$4 sm:$0xff]  }
 0x13e   :  { %1984 = vmatprep.subr.bf16.mxu0 %v3124_v62  ;;  %2066 = vmatprep.subr.bf16.mxu1 %v3127_v63  ;;  %v3179_v62 = vld [vmem:[#allocation4 + $0x2e8] ss:$16 sps:$4 sm:$0xff]   ;;  %v3184_v63 = vld [vmem:[#allocation4 + $0x304] ss:$16 sps:$4 sm:$0xff]  }
 0x141   :  { %1985 = vmatpush1.bf16.msra.mxu0 %v3122_v0  ;;  %2067 = vmatpush1.bf16.msra.mxu1 %v3125_v1  ;;  %v3187_v0 = vld [vmem:[#allocation4 + $0x30c] ss:$16 sps:$4 sm:$0xff]   ;;  %v3182_v1 = vld [vmem:[#allocation4 + $0x300] ss:$16 sps:$4 sm:$0xff]  }
 0x142   :  { %1986 = vmatprep.subr.bf16.mxu0 %v3130_v2  ;;  %2068 = vmatprep.subr.bf16.mxu1 %v3133_v3  ;;  %v3185_v2 = vld [vmem:[#allocation4 + $0x308] ss:$16 sps:$4 sm:$0xff]   ;;  %v3190_v3 = vld [vmem:[#allocation4 + $0x324] ss:$16 sps:$4 sm:$0xff]  }
 0x145   :  { %1987 = vmatpush1.bf16.msra.mxu0 %v3128_v4  ;;  %2069 = vmatpush1.bf16.msra.mxu1 %v3131_v5  ;;  %v3193_v4 = vld [vmem:[#allocation4 + $0x32c] ss:$16 sps:$4 sm:$0xff]   ;;  %v3188_v5 = vld [vmem:[#allocation4 + $0x320] ss:$16 sps:$4 sm:$0xff]  }
 0x146   :  { %1997 = vmatprep.subr.bf16.mxu0 %v3136_v6  ;;  %2079 = vmatprep.subr.bf16.mxu1 %v3139_v7  ;;  %v3191_v6 = vld [vmem:[#allocation4 + $0x328] ss:$16 sps:$4 sm:$0xff]   ;;  %v3196_v7 = vld [vmem:[#allocation4 + $0x344] ss:$16 sps:$4 sm:$0xff]  }
 0x1db   :  { %v1069_v11 = vpop.f32.mrb[0].mxu0  ;;  %v3507_v14 = vpop.f32.mrb[0].mxu1 }
 0x1dc   :  { %v2811_v17 = vadd.f32 %v1069_v11, %v337_v9  ;;  %v1071_v18 = vpop.f32.mrb[1].mxu0  ;;  %v1153_v19 = vpop.f32.mrb[1].mxu1  ;;  %v3199_v9 = vld [vmem:[#allocation4 + $0x34c] ss:$16 sps:$4 sm:$0xff]   ;;  %v3202_v11 = vld [vmem:[#allocation4 + $0x364] ss:$16 sps:$4 sm:$0xff]  }
 0x1dd   :  { %v2812_v20 = vadd.f32 %v1071_v18, %v341_v51  ;;  %v2814_v21 = vadd.f32 %v1153_v19, %v349_v10  ;;  %v1073_v22 = vpop.f32.mrb[2].mxu0  ;;  %v1155_v23 = vpop.f32.mrb[2].mxu1  ;;  %v3194_v51 = vld [vmem:[#allocation4 + $0x340] ss:$16 sps:$4 sm:$0xff]   ;;  %v3197_v10 = vld [vmem:[#allocation4 + $0x348] ss:$16 sps:$4 sm:$0xff]  }
 0x1de   :  { %v1158_v24 = vmax.f32 %v2811_v17, 0.0  ;;  %v1074_v25 = vpop.f32.mrb[3].mxu0  ;;  %v1156_v26 = vpop.f32.mrb[3].mxu1  ;;  %v3205_v17 = vld [vmem:[#allocation4 + $0x36c] ss:$16 sps:$4 sm:$0xff]  }
 0x1df   :  { %v1159_v27 = vmax.f32 %v2812_v20, 0.0  ;;  %v1161_v28 = vmax.f32 %v2814_v21, 0.0  ;;  %v3200_v18 = vld [vmem:[#allocation4 + $0x360] ss:$16 sps:$4 sm:$0xff]   ;;  %v3203_v19 = vld [vmem:[#allocation4 + $0x368] ss:$16 sps:$4 sm:$0xff]  }
 0x1e0   :  { %v1162_v32 = vpack.c.bf16 %v1158_v24, %v1158_v24  ;;  %v3208_v20 = vld [vmem:[#allocation4 + $0x384] ss:$16 sps:$4 sm:$0xff]   ;;  %v3211_v21 = vld [vmem:[#allocation4 + $0x38c] ss:$16 sps:$4 sm:$0xff]   ;;  %v3206_v22 = vld [vmem:[#allocation4 + $0x380] ss:$16 sps:$4 sm:$0xff]  }
 0x1e1   :  { %v1163_v29 = vpack.c.bf16 %v1159_v27, %v1159_v27  ;;  %v1165_v35 = vpack.c.bf16 %v1161_v28, %v1161_v28  ;;  %v3209_v23 = vld [vmem:[#allocation4 + $0x388] ss:$16 sps:$4 sm:$0xff]   ;;  %v3214_v24 = vld [vmem:[#allocation4 + $0x3a4] ss:$16 sps:$4 sm:$0xff]   ;;  %v3217_v25 = vld [vmem:[#allocation4 + $0x3ac] ss:$16 sps:$4 sm:$0xff]   ;;  %v345_v28 = vrot.slane %v3499_v8, %v3456_v13 }
 0x1e2   :  { %v3212_v26 = vld [vmem:[#allocation4 + $0x3a0] ss:$16 sps:$4 sm:$0xff]   ;;  %v3215_v27 = vld [vmem:[#allocation4 + $0x3a8] ss:$16 sps:$4 sm:$0xff]  }
 0x1e3   :  { %1988 = vmatprep.mubr.bf16.mxu0 %v1163_v29  ;;  %2070 = vmatprep.mubr.bf16.mxu1 %v1163_v29  ;;  %v3220_v29 = vld [vmem:[#allocation4 + $0x3c4] ss:$16 sps:$4 sm:$0xff]  }
 0x1e4   :  { %1989 = vmatmul.mubr.bf16.vlgmr.msra.gmra.mrb[4].mxu0 %v1162_v32  ;;  %2071 = vmatmul.mubr.bf16.vlgmr.msra.gmra.mrb[4].mxu1 %v1162_v32  ;;  %v3221_v32 = vld [vmem:[#allocation4 + $0x3c8] ss:$16 sps:$4 sm:$0xff]   ;;  %v3230_v8 = vld [vmem:[#allocation6 + $0x40] sm:$0xff]  }
 0x1e5   :  { %1998 = vmatpush1.bf16.msra.mxu0 %v3134_v30  ;;  %2080 = vmatpush1.bf16.msra.mxu1 %v3137_v31  ;;  %v3223_v30 = vld [vmem:[#allocation4 + $0x3cc] ss:$16 sps:$4 sm:$0xff]   ;;  %v3218_v31 = vld [vmem:[#allocation4 + $0x3c0] ss:$16 sps:$4 sm:$0xff]  }
 0x1e6   :  { %2029 = vmatprep.mubr.bf16.mxu0 %v1165_v35  ;;  %2111 = vmatprep.mubr.bf16.mxu1 %v1165_v35  ;;  %v3229_v35 = vld [vmem:[#allocation4 + $0x3ec] ss:$16 sps:$4 sm:$0xff]  }
 0x1e7   :  { %1999 = vmatprep.subr.bf16.mxu0 %v3142_v33  ;;  %2081 = vmatprep.subr.bf16.mxu1 %v3145_v34  ;;  %v2813_v33 = vadd.f32 %v3507_v14, %v345_v28  ;;  %v3226_v34 = vld [vmem:[#allocation4 + $0x3e4] ss:$16 sps:$4 sm:$0xff]   ;;  %v3234_v14 = vld [vmem:[#allocation6 + $0x48] sm:$0xff]  }
 0x1e9   :  { %2000 = vmatpush1.bf16.msra.mxu0 %v3140_v36  ;;  %2082 = vmatpush1.bf16.msra.mxu1 %v3143_v37  ;;  %v3224_v36 = vld [vmem:[#allocation4 + $0x3e0] ss:$16 sps:$4 sm:$0xff]   ;;  %v3227_v37 = vld [vmem:[#allocation4 + $0x3e8] ss:$16 sps:$4 sm:$0xff]  }
 0x1ea   :  { %2001 = vmatprep.subr.bf16.mxu0 %v3148_v38  ;;  %2083 = vmatprep.subr.bf16.mxu1 %v3151_v39  ;;  %v1160_v38 = vmax.f32 %v2813_v33, 0.0  ;;  %v3231_v39 = vld [vmem:[#allocation6 + $0xc0] sm:$0xff]  }
 0x1ed   :  { %2002 = vmatpush1.bf16.msra.mxu0 %v3146_v40  ;;  %2084 = vmatpush1.bf16.msra.mxu1 %v3149_v41  ;;  %v3232_v40 = vld [vmem:[#allocation6] sm:$0xff]  }
 0x1ee   :  { %2003 = vmatprep.subr.bf16.mxu0 %v3154_v42  ;;  %2085 = vmatprep.subr.bf16.mxu1 %v3157_v43  ;;  %v3233_v41 = vld [vmem:[#allocation6 + $0x80] sm:$0xff]   ;;  %v1164_v42 = vpack.c.bf16 %v1160_v38, %v1160_v38  ;;  %v3235_v43 = vld [vmem:[#allocation6 + $0xc8] sm:$0xff]  }
 0x1f1   :  { %2004 = vmatpush1.bf16.msra.mxu0 %v3152_v44  ;;  %2086 = vmatpush1.bf16.msra.mxu1 %v3155_v45  ;;  %v3236_v44 = vld [vmem:[#allocation6 + $0x8] sm:$0xff]  }
 0x1f2   :  { %2005 = vmatprep.subr.bf16.mxu0 %v3160_v46  ;;  %2087 = vmatprep.subr.bf16.mxu1 %v3163_v47  ;;  %v3237_v45 = vld [vmem:[#allocation6 + $0x88] sm:$0xff]   ;;  %v3238_v46 = vld [vmem:[#allocation6 + $0x50] sm:$0xff]  }
 0x1f3   :  { %v3239_v47 = vld [vmem:[#allocation6 + $0xd0] sm:$0xff]  }
 0x1f5   :  { %2006 = vmatpush1.bf16.msra.mxu0 %v3158_v48  ;;  %2088 = vmatpush1.bf16.msra.mxu1 %v3161_v49  ;;  %v3240_v48 = vld [vmem:[#allocation6 + $0x10] sm:$0xff]  }
 0x1f6   :  { %2007 = vmatprep.subr.bf16.mxu0 %v3166_v50  ;;  %2089 = vmatprep.subr.bf16.mxu1 %v3169_v52  ;;  %v3241_v49 = vld [vmem:[#allocation6 + $0x90] sm:$0xff]   ;;  %v3242_v50 = vld [vmem:[#allocation6 + $0x58] sm:$0xff]  }
 0x1f7   :  { %v3243_v52 = vld [vmem:[#allocation6 + $0xd8] sm:$0xff]  }
 0x1f9   :  { %2008 = vmatpush1.bf16.msra.mxu0 %v3164_v53  ;;  %2090 = vmatpush1.bf16.msra.mxu1 %v3167_v54  ;;  %v3244_v53 = vld [vmem:[#allocation6 + $0x18] sm:$0xff]  }
 0x1fa   :  { %2009 = vmatprep.subr.bf16.mxu0 %v3172_v55  ;;  %2091 = vmatprep.subr.bf16.mxu1 %v3175_v56  ;;  %v3245_v54 = vld [vmem:[#allocation6 + $0x98] sm:$0xff]   ;;  %v3246_v55 = vld [vmem:[#allocation6 + $0x60] sm:$0xff]  }
 0x1fb   :  { %v3247_v56 = vld [vmem:[#allocation6 + $0xe0] sm:$0xff]  }
 0x1fd   :  { %2010 = vmatpush1.bf16.msra.mxu0 %v3170_v57  ;;  %2092 = vmatpush1.bf16.msra.mxu1 %v3173_v58  ;;  %v3248_v57 = vld [vmem:[#allocation6 + $0x20] sm:$0xff]  }
 0x1fe   :  { %2011 = vmatprep.subr.bf16.mxu0 %v3178_v59  ;;  %2093 = vmatprep.subr.bf16.mxu1 %v3181_v60  ;;  %v3249_v58 = vld [vmem:[#allocation6 + $0xa0] sm:$0xff]   ;;  %v3250_v59 = vld [vmem:[#allocation6 + $0x68] sm:$0xff]  }
 0x1ff   :  { %v3251_v60 = vld [vmem:[#allocation6 + $0xe8] sm:$0xff]  }
 0x201   :  { %2012 = vmatpush1.bf16.msra.mxu0 %v3176_v61  ;;  %2094 = vmatpush1.bf16.msra.mxu1 %v3179_v62  ;;  %v3252_v61 = vld [vmem:[#allocation6 + $0x28] sm:$0xff]  }
 0x202   :  { %2013 = vmatprep.subr.bf16.mxu0 %v3184_v63  ;;  %2095 = vmatprep.subr.bf16.mxu1 %v3187_v0  ;;  %v3253_v62 = vld [vmem:[#allocation6 + $0xa8] sm:$0xff]   ;;  %v3254_v63 = vld [vmem:[#allocation6 + $0x70] sm:$0xff]  }
 0x203   :  { %v3255_v0 = vld [vmem:[#allocation6 + $0xf0] sm:$0xff]  }
 0x205   :  { %2014 = vmatpush1.bf16.msra.mxu0 %v3182_v1  ;;  %2096 = vmatpush1.bf16.msra.mxu1 %v3185_v2  ;;  %v3256_v1 = vld [vmem:[#allocation6 + $0x30] sm:$0xff]  }
 0x206   :  { %2015 = vmatprep.subr.bf16.mxu0 %v3190_v3  ;;  %2097 = vmatprep.subr.bf16.mxu1 %v3193_v4  ;;  %v3257_v2 = vld [vmem:[#allocation6 + $0xb0] sm:$0xff]   ;;  %v3258_v3 = vld [vmem:[#allocation6 + $0x78] sm:$0xff]  }
 0x207   :  { %v3259_v4 = vld [vmem:[#allocation6 + $0xf8] sm:$0xff]  }
 0x209   :  { %2016 = vmatpush1.bf16.msra.mxu0 %v3188_v5  ;;  %2098 = vmatpush1.bf16.msra.mxu1 %v3191_v6  ;;  %v3260_v5 = vld [vmem:[#allocation6 + $0x38] sm:$0xff]  }
 0x20a   :  { %2017 = vmatprep.subr.bf16.mxu0 %v3196_v7  ;;  %2099 = vmatprep.subr.bf16.mxu1 %v3199_v9  ;;  %v3261_v6 = vld [vmem:[#allocation6 + $0xb8] sm:$0xff]   ;;  %v1294_v7 = vld [vmem:[%s3531_s6] sm:$0xf] }
 0x20b   :  { %v1299_v9 = vrot.slane %v1294_v7, %v3453_v12 }
 0x20d   :  { %2018 = vmatpush1.bf16.msra.mxu0 %v3194_v51  ;;  %2100 = vmatpush1.bf16.msra.mxu1 %v3197_v10  ;;  %v1307_v51 = vrot.slane %v1294_v7, %v3456_v13  ;;  %v1303_v10 = vrot.slane %v1294_v7, %v3460_v15 }
 0x20e   :  { %2019 = vmatprep.subr.bf16.mxu0 %v3202_v11  ;;  %2101 = vmatprep.subr.bf16.mxu1 %v3205_v17  ;;  %v1311_v11 = vrot.slane %v1294_v7, %v3463_v16 }
 0x211   :  { %2020 = vmatpush1.bf16.msra.mxu0 %v3200_v18  ;;  %2102 = vmatpush1.bf16.msra.mxu1 %v3203_v19 }
 0x212   :  { %2021 = vmatprep.subr.bf16.mxu0 %v3208_v20  ;;  %2103 = vmatprep.subr.bf16.mxu1 %v3211_v21 }
 0x215   :  { %2022 = vmatpush1.bf16.msra.mxu0 %v3206_v22  ;;  %2104 = vmatpush1.bf16.msra.mxu1 %v3209_v23 }
 0x216   :  { %2023 = vmatprep.subr.bf16.mxu0 %v3214_v24  ;;  %2105 = vmatprep.subr.bf16.mxu1 %v3217_v25 }
 0x219   :  { %2024 = vmatpush1.bf16.msra.mxu0 %v3212_v26  ;;  %2106 = vmatpush1.bf16.msra.mxu1 %v3215_v27 }
 0x21a   :  { %2025 = vmatprep.subr.bf16.mxu0 %v3220_v29  ;;  %2107 = vmatprep.subr.bf16.mxu1 %v3223_v30 }
 0x21d   :  { %2026 = vmatpush1.bf16.msra.mxu0 %v3218_v31  ;;  %2108 = vmatpush1.bf16.msra.mxu1 %v3221_v32 }
 0x21e   :  { %2027 = vmatprep.subr.bf16.mxu0 %v3226_v34  ;;  %2109 = vmatprep.subr.bf16.mxu1 %v3229_v35  ;;  %v2734_v35 = vld [vmem:[%s3533_s8] ss:$0 sm:$0xff] }
 0x221   :  { %2028 = vmatpush1.bf16.msra.mxu0 %v3224_v36  ;;  %2110 = vmatpush1.bf16.msra.mxu1 %v3227_v37 }
 0x222   :  { %2767 = vmatprep.subr.bf16.mxu0 %v3230_v8  ;;  %2789 = vmatprep.subr.bf16.mxu1 %v3231_v39 }
 0x224   :  { %2030 = vmatmul.mubr.bf16.vlgmr.msra.gmra.mrb[4].mxu0 %v1164_v42  ;;  %2112 = vmatmul.mubr.bf16.vlgmr.msra.gmra.mrb[4].mxu1 %v1164_v42 }
 0x225   :  { %2768 = vmatpush3.bf16.msra.mxu0 %v3232_v40  ;;  %2790 = vmatpush3.bf16.msra.mxu1 %v3233_v41 }
 0x226   :  { %2769 = vmatprep.subr.bf16.mxu0 %v3234_v14  ;;  %2791 = vmatprep.subr.bf16.mxu1 %v3235_v43 }
 0x229   :  { %2770 = vmatpush3.bf16.msra.mxu0 %v3236_v44  ;;  %2792 = vmatpush3.bf16.msra.mxu1 %v3237_v45 }
 0x22a   :  { %2771 = vmatprep.subr.bf16.mxu0 %v3238_v46  ;;  %2793 = vmatprep.subr.bf16.mxu1 %v3239_v47 }
 0x22d   :  { %2772 = vmatpush3.bf16.msra.mxu0 %v3240_v48  ;;  %2794 = vmatpush3.bf16.msra.mxu1 %v3241_v49 }
 0x22e   :  { %2773 = vmatprep.subr.bf16.mxu0 %v3242_v50  ;;  %2795 = vmatprep.subr.bf16.mxu1 %v3243_v52 }
 0x231   :  { %2774 = vmatpush3.bf16.msra.mxu0 %v3244_v53  ;;  %2796 = vmatpush3.bf16.msra.mxu1 %v3245_v54 }
 0x232   :  { %2775 = vmatprep.subr.bf16.mxu0 %v3246_v55  ;;  %2797 = vmatprep.subr.bf16.mxu1 %v3247_v56 }
 0x235   :  { %2776 = vmatpush3.bf16.msra.mxu0 %v3248_v57  ;;  %2798 = vmatpush3.bf16.msra.mxu1 %v3249_v58 }
 0x236   :  { %2777 = vmatprep.subr.bf16.mxu0 %v3250_v59  ;;  %2799 = vmatprep.subr.bf16.mxu1 %v3251_v60 }
 0x239   :  { %2778 = vmatpush3.bf16.msra.mxu0 %v3252_v61  ;;  %2800 = vmatpush3.bf16.msra.mxu1 %v3253_v62 }
 0x23a   :  { %2779 = vmatprep.subr.bf16.mxu0 %v3254_v63  ;;  %2801 = vmatprep.subr.bf16.mxu1 %v3255_v0 }
 0x23d   :  { %2780 = vmatpush3.bf16.msra.mxu0 %v3256_v1  ;;  %2802 = vmatpush3.bf16.msra.mxu1 %v3257_v2 }
 0x23e   :  { %2781 = vmatprep.subr.bf16.mxu0 %v3258_v3  ;;  %2803 = vmatprep.subr.bf16.mxu1 %v3259_v4 }
 0x241   :  { %2782 = vmatpush3.bf16.msra.mxu0 %v3260_v5  ;;  %2804 = vmatpush3.bf16.msra.mxu1 %v3261_v6 }
 0x2f7   :  { %v2031_v17 = vpop.f32.mrb[4].mxu0  ;;  %v2113_v18 = vpop.f32.mrb[4].mxu1 }
 0x2f8   :  { %v2815_v19 = vadd.f32 %v2031_v17, %v1299_v9  ;;  %v2817_v20 = vadd.f32 %v2113_v18, %v1307_v51  ;;  %v2033_v21 = vpop.f32.mrb[5].mxu0  ;;  %v2115_v22 = vpop.f32.mrb[5].mxu1 }
 0x2f9   :  { %v2816_v23 = vadd.f32 %v2033_v21, %v1303_v10  ;;  %v2818_v24 = vadd.f32 %v2115_v22, %v1311_v11  ;;  %v2035_v25 = vpop.f32.mrb[6].mxu0  ;;  %v2117_v26 = vpop.f32.mrb[6].mxu1 }
 0x2fa   :  { %v2120_v27 = vmax.f32 %v2815_v19, 0.0  ;;  %v2122_v28 = vmax.f32 %v2817_v20, 0.0  ;;  %v2036_v29 = vpop.f32.mrb[7].mxu0  ;;  %v2118_v12 = vpop.f32.mrb[7].mxu1 }
 0x2fb   :  { %v2121_v30 = vmax.f32 %v2816_v23, 0.0  ;;  %v2123_v13 = vmax.f32 %v2818_v24, 0.0 }
 0x2fc   :  { %v2124_v32 = vpack.c.bf16 %v2120_v27, %v2120_v27  ;;  %v2126_v16 = vpack.c.bf16 %v2122_v28, %v2122_v28 }
 0x2fd   :  { %v2125_v31 = vpack.c.bf16 %v2121_v30, %v2121_v30  ;;  %v2127_v15 = vpack.c.bf16 %v2123_v13, %v2123_v13 }
 0x2ff   :  { %2423 = vmatprep.mubr.bf16.mxu0 %v2125_v31  ;;  %2463 = vmatprep.mubr.bf16.mxu1 %v2127_v15 }
 0x300   :  { %2424 = vmatmul.mubr.bf16.vlgmr.msra.gmra.mrb[8].mxu0 %v2124_v32  ;;  %2464 = vmatmul.mubr.bf16.vlgmr.msra.gmra.mrb[8].mxu1 %v2126_v16 }
 0x3d3   :  { %v2783_v33 = vpop.f32.mrb[8].mxu0  ;;  %v2805_v34 = vpop.f32.mrb[8].mxu1 }
 0x3d4   :  { %v2784_v36 = vpop.f32.mrb[9].mxu0  ;;  %v2806_v37 = vpop.f32.mrb[9].mxu1 }
 0x3d5   :  { %v2785_v38 = vadd.f32 %v2784_v36, %v2783_v33  ;;  %v2807_v8 = vadd.f32 %v2806_v37, %v2805_v34  ;;  %v2786_v39 = vpop.f32.mrb[10].mxu0  ;;  %v2808_v40 = vpop.f32.mrb[10].mxu1 }
 0x3d6   :  { %v2787_v41 = vpop.f32.mrb[11].mxu0  ;;  %v2809_v42 = vpop.f32.mrb[11].mxu1 }
 0x3d7   :  { %v2426_v14 = vadd.f32 %v2785_v38, %v2734_v35 }
 0x3d9   :  { %v2466_v43 = vadd.f32 %v2807_v8, %v2426_v14 }
 0x3db   :  { %2471 = vst [vmem:[%s3534_s9] sm:$0xff] %v2466_v43 }
 0x3dc   :  { %2476 = vsyncpa [#allocation3], 1 }
 0x3dd   :  { %2477 = vsyncpa [#allocation5], 1 }

</bundles_post_ra>
